<compile_context>
chip_gen: v6e
topology: v6e:2x2x1
jax: 0.10.0
libtpu: 0.0.40
codegen_flags: <defaults>
</compile_context>

<pallas_src>
import functools

import jax
import jax.numpy as jnp
from jax import lax
from jax.experimental import pallas as pl
from jax.experimental.pallas import tpu as pltpu


def _fd_update_kernel(z_ref, dz_ref, znew_ref, psum_ref, *,
                      lr, d, pack, rows, tile_rows, ragged):
    """One row-tile of the lane-dense view:
         Z_new = Z + lr * dZ                         (native dtype, elementwise)
         psum  = sum over tile of per-row ||dZ||_2   (f32 per-tile partial)
    Each lane-dense row of width pack*d holds `pack` original rows of width d.
    """
    i = pl.program_id(0)

    z = z_ref[...]
    dz = dz_ref[...]

    # updateZ: Z += dZ * lr (kept in input dtype; bf16 stays bf16).
    znew_ref[...] = (z + dz * jnp.asarray(lr, dz.dtype)).astype(znew_ref.dtype)

    # torch.norm(dZ, dim=-1): per original-row L2 norm, accumulated in f32.
    dz2 = dz.astype(jnp.float32)
    dz2 = dz2 * dz2
    norm_sum = jnp.zeros((dz2.shape[0], 1), jnp.float32)
    for g in range(pack):  # static unroll over the D-wide lane groups
        ss = jnp.sum(dz2[:, g * d:(g + 1) * d], axis=-1, keepdims=True)
        norm_sum = norm_sum + jnp.sqrt(ss)

    if ragged:
        # Mask rows of the (padded) last tile that lie past the true extent.
        row_ids = i * tile_rows + lax.broadcasted_iota(
            jnp.int32, norm_sum.shape, 0)
        norm_sum = jnp.where(row_ids < rows, norm_sum, 0.0)

    psum_ref[...] = jnp.sum(norm_sum, axis=0, keepdims=True).reshape(1, 1, 1)


def _choose_tile_rows(rows, width, itemsize, vmem_budget_bytes):
    """Largest row-tile whose pipelined buffers fit the VMEM budget."""
    # Sublane packing: f32 -> 8 rows/vreg, bf16 -> 16, int8/fp8 -> 32.
    sub = max(8, 32 // itemsize)
    # 2 inputs + 1 output, each double-buffered by the Pallas pipeline.
    t = vmem_budget_bytes // (6 * width * itemsize)
    t = max(sub, (t // sub) * sub)
    rows_ceil = ((rows + sub - 1) // sub) * sub
    return int(min(t, rows_ceil))


def force_directed_update(Z, dZ, lr=1.0, tile_rows=None,
                          vmem_budget_bytes=12 * 1024 * 1024):
    """Returns (Z_new, dZ_norm_avg):
       Z_new       : (N, D), same dtype as Z   -- result of updateZ()
       dZ_norm_avg : f32 scalar                -- torch.norm(dZ, dim=-1).mean()
    """
    N, D = Z.shape
    assert dZ.shape == (N, D)

    # Lane-dense repack: fold `pack` consecutive rows into one 128-wide row so
    # HBM traffic uses full 128-lane bursts.  Row-major reshape => no data
    # movement.  Otherwise fall back to full-width (.., D) blocks.
    pack = 1
    if D < 128 and 128 % D == 0 and N % (128 // D) == 0:
        pack = 128 // D
    W = D * pack
    rows = N // pack

    Zp = Z.reshape(rows, W)
    dZp = dZ.reshape(rows, W)

    itemsize = jnp.dtype(Z.dtype).itemsize
    if tile_rows is None:
        tile_rows = _choose_tile_rows(rows, W, itemsize, vmem_budget_bytes)
    num_tiles = pl.cdiv(rows, tile_rows)
    ragged = (rows % tile_rows) != 0

    kernel = functools.partial(
        _fd_update_kernel, lr=float(lr), d=D, pack=pack,
        rows=rows, tile_rows=tile_rows, ragged=ragged)

    z_new, psums = pl.pallas_call(
        kernel,
        out_shape=(
            jax.ShapeDtypeStruct((rows, W), Z.dtype),
            jax.ShapeDtypeStruct((num_tiles, 1, 1), jnp.float32),
        ),
        grid_spec=pltpu.PrefetchScalarGridSpec(
            num_scalar_prefetch=0,
            grid=(num_tiles,),
            in_specs=[
                pl.BlockSpec((tile_rows, W), lambda i: (i, 0)),
                pl.BlockSpec((tile_rows, W), lambda i: (i, 0)),
            ],
            out_specs=[
                pl.BlockSpec((tile_rows, W), lambda i: (i, 0)),
                pl.BlockSpec((1, 1, 1), lambda i: (i, 0, 0)),
            ],
        ),
        compiler_params=pltpu.CompilerParams(
            # Per-tile partial outputs -> no cross-step dependency -> parallel
            # (megacore-shardable on v7x).
            dimension_semantics=("parallel",),
            vmem_limit_bytes=32 * 1024 * 1024,
        ),
        # Z is persistent optimizer state: update it in place.
        input_output_aliases={0: 0},
    )(Zp, dZp)

    # Tiny epilogue: sum of per-tile partials, division folded into a multiply.
    norm_avg = jnp.sum(psums) * jnp.float32(1.0 / N)
    return z_new.reshape(N, D), norm_avg


# TODO(synk): ForceDirected.forward() is abstract (raises NotImplementedError)
# in the reference module, so there is no force computation to translate here;
# only updateZ() and the dZ-norm-average reduction are implemented.


if __name__ == "__main__":
    root = jax.random.PRNGKey(0)

    def check_case(idx, N, D, dtype, lr, tile_rows=None, z_tol=1e-5, n_tol=1e-4):
        kz, kd = jax.random.split(jax.random.fold_in(root, idx))
        Z = jax.random.normal(kz, (N, D), dtype=jnp.float32).astype(dtype)
        dZ = (jax.random.normal(kd, (N, D), dtype=jnp.float32) * 0.1).astype(dtype)

        z_new, norm_avg = force_directed_update(Z, dZ, lr=lr, tile_rows=tile_rows)
        jax.block_until_ready((z_new, norm_avg))

        # Reference (plain JAX, mirrors the PyTorch semantics).
        z_ref = Z + dZ * jnp.asarray(lr, dtype)
        norm_ref = jnp.mean(jnp.linalg.norm(dZ.astype(jnp.float32), axis=-1))

        assert z_new.shape == (N, D) and z_new.dtype == jnp.dtype(dtype)
        assert jnp.allclose(z_new.astype(jnp.float32), z_ref.astype(jnp.float32),
                            atol=z_tol, rtol=z_tol), f"case {idx}: Z mismatch"
        assert jnp.allclose(norm_avg, norm_ref,
                            atol=n_tol, rtol=n_tol), f"case {idx}: norm mismatch"

    # Small shapes consistent with an embedding table (N nodes, D dims).
    # 1) f32, D=32 -> lane-dense pack of 4 rows/128 lanes, auto (large) tile.
    check_case(0, N=1024, D=32, dtype=jnp.float32, lr=1.0)
    # 2) f32, forced small tiles -> multi-tile partials + ragged last tile.
    check_case(1, N=1024, D=32, dtype=jnp.float32, lr=0.5, tile_rows=48)
    # 3) bf16 update path (arithmetic stays bf16; norm accumulated in f32).
    check_case(2, N=512, D=64, dtype=jnp.bfloat16, lr=1.0,
               z_tol=2e-2, n_tol=5e-3)

    print("KERNEL_OK")
</pallas_src>

<mosaic_0001>
module attributes {stable_mosaic.version = 11 : i64} {
  func.func @_fd_update_kernel(%arg0: i32, %arg1: memref<256x128xf32, #tpu.memory_space<vmem>>, %arg2: memref<256x128xf32, #tpu.memory_space<vmem>>, %arg3: memref<256x128xf32, #tpu.memory_space<vmem>>, %arg4: memref<1x1x1xf32, #tpu.memory_space<vmem>>) attributes {dimension_semantics = [#tpu.dimension_semantics<parallel>], iteration_bounds = array<i64: 1>, scalar_prefetch = 0 : i64, scratch_operands = 0 : i64, tpu.core_type = #tpu.core_type<tc>, window_params = [{transform_indices = @transform_0, window_bounds = array<i64: 256, 128>}, {transform_indices = @transform_1, window_bounds = array<i64: 256, 128>}, {transform_indices = @transform_2, window_bounds = array<i64: 256, 128>}, {transform_indices = @transform_3, window_bounds = array<i64: 1, 1, 1>}]} {
    %c0 = arith.constant 0 : index
    %c0_0 = arith.constant 0 : index
    %0 = vector.load %arg1[%c0, %c0_0] : memref<256x128xf32, #tpu.memory_space<vmem>>, vector<256x128xf32>
    %c0_1 = arith.constant 0 : index
    %c0_2 = arith.constant 0 : index
    %1 = vector.load %arg2[%c0_1, %c0_2] : memref<256x128xf32, #tpu.memory_space<vmem>>, vector<256x128xf32>
    %cst = arith.constant 1.000000e+00 : f32
    %2 = vector.broadcast %cst : f32 to vector<256x128xf32>
    %3 = arith.mulf %1, %2 : vector<256x128xf32>
    %4 = arith.addf %0, %3 : vector<256x128xf32>
    %c0_3 = arith.constant 0 : index
    %c0_4 = arith.constant 0 : index
    %5 = vector.load %arg3[%c0_3, %c0_4] : memref<256x128xf32, #tpu.memory_space<vmem>>, vector<256x128xf32>
    tpu.vector_store %arg3[%c0_3, %c0_4], %4 {strides = array<i32>} : memref<256x128xf32, #tpu.memory_space<vmem>>, vector<256x128xf32>,
    %6 = arith.mulf %1, %1 : vector<256x128xf32>
    %cst_5 = arith.constant 0.000000e+00 : f32
    %7 = vector.broadcast %cst_5 : f32 to vector<256x1xf32>
    %8 = vector.extract_strided_slice %6 {offsets = [0, 0], sizes = [256, 32], strides = [1, 1]} : vector<256x128xf32> to vector<256x32xf32>
    %cst_6 = arith.constant dense<0.000000e+00> : vector<256xf32>
    %9 = vector.multi_reduction <add>, %8, %cst_6 [1] : vector<256x32xf32> to vector<256xf32>
    %10 = vector.shape_cast %9 : vector<256xf32> to vector<256x1xf32>
    %11 = math.sqrt %10 : vector<256x1xf32>
    %12 = arith.addf %7, %11 : vector<256x1xf32>
    %13 = vector.extract_strided_slice %6 {offsets = [0, 32], sizes = [256, 32], strides = [1, 1]} : vector<256x128xf32> to vector<256x32xf32>
    %cst_7 = arith.constant dense<0.000000e+00> : vector<256xf32>
    %14 = vector.multi_reduction <add>, %13, %cst_7 [1] : vector<256x32xf32> to vector<256xf32>
    %15 = vector.shape_cast %14 : vector<256xf32> to vector<256x1xf32>
    %16 = math.sqrt %15 : vector<256x1xf32>
    %17 = arith.addf %12, %16 : vector<256x1xf32>
    %18 = vector.extract_strided_slice %6 {offsets = [0, 64], sizes = [256, 32], strides = [1, 1]} : vector<256x128xf32> to vector<256x32xf32>
    %cst_8 = arith.constant dense<0.000000e+00> : vector<256xf32>
    %19 = vector.multi_reduction <add>, %18, %cst_8 [1] : vector<256x32xf32> to vector<256xf32>
    %20 = vector.shape_cast %19 : vector<256xf32> to vector<256x1xf32>
    %21 = math.sqrt %20 : vector<256x1xf32>
    %22 = arith.addf %17, %21 : vector<256x1xf32>
    %23 = vector.extract_strided_slice %6 {offsets = [0, 96], sizes = [256, 32], strides = [1, 1]} : vector<256x128xf32> to vector<256x32xf32>
    %cst_9 = arith.constant dense<0.000000e+00> : vector<256xf32>
    %24 = vector.multi_reduction <add>, %23, %cst_9 [1] : vector<256x32xf32> to vector<256xf32>
    %25 = vector.shape_cast %24 : vector<256xf32> to vector<256x1xf32>
    %26 = math.sqrt %25 : vector<256x1xf32>
    %27 = arith.addf %22, %26 : vector<256x1xf32>
    %cst_10 = arith.constant dense<0.000000e+00> : vector<1xf32>
    %28 = vector.multi_reduction <add>, %27, %cst_10 [0] : vector<256x1xf32> to vector<1xf32>
    %29 = vector.shape_cast %28 : vector<1xf32> to vector<1x1xf32>
    %30 = vector.shape_cast %29 : vector<1x1xf32> to vector<1x1x1xf32>
    %c0_11 = arith.constant 0 : index
    %c0_12 = arith.constant 0 : index
    %c0_13 = arith.constant 0 : index
    %31 = vector.load %arg4[%c0_11, %c0_12, %c0_13] : memref<1x1x1xf32, #tpu.memory_space<vmem>>, vector<1x1x1xf32>
    tpu.vector_store %arg4[%c0_11, %c0_12, %c0_13], %30 {strides = array<i32>} : memref<1x1x1xf32, #tpu.memory_space<vmem>>, vector<1x1x1xf32>,
    return
  }
  func.func @transform_0(%arg0: i32) -> (i32, i32) {
    %c0_i32 = arith.constant 0 : i32
    %c0_i32_0 = arith.constant 0 : i32
    return %arg0, %c0_i32 : i32, i32
  }
  func.func @transform_1(%arg0: i32) -> (i32, i32) {
    %c0_i32 = arith.constant 0 : i32
    %c0_i32_0 = arith.constant 0 : i32
    return %arg0, %c0_i32 : i32, i32
  }
  func.func @transform_2(%arg0: i32) -> (i32, i32) {
    %c0_i32 = arith.constant 0 : i32
    %c0_i32_0 = arith.constant 0 : i32
    return %arg0, %c0_i32 : i32, i32
  }
  func.func @transform_3(%arg0: i32) -> (i32, i32, i32) {
    %c0_i32 = arith.constant 0 : i32
    %c0_i32_0 = arith.constant 0 : i32
    %c0_i32_1 = arith.constant 0 : i32
    return %arg0, %c0_i32, %c0_i32_0 : i32, i32, i32
  }
}

</mosaic_0001>

<bundles_post_ra>
// kernel: tpu_custom_call.1
= control target key start
LH: loop header
LB: loop body
LE: loop exit
PB: predicated region body
PF: predicated region fallthrough
CT: control target
= control target key end

     0   :  { %9 = vsyncpa [#allocation3], 0  ;;  %s4832_s0 = inlined_call_operand.hbm [shape: f32[256,128], index: 0, kind: input, shape index: {}, may-alias: {0,2}]   ;;  %s4833_s1 = inlined_call_operand.vmem [shape: f32[256,128], index: 1, kind: input, shape index: {}]   ;;  %s4834_s2 = inlined_call_operand.hbm [shape: f32[256,128], index: 2, kind: output, shape index: {0}, may-alias: {0,2}]   ;;  %s4835_s3 = inlined_call_operand.hbm [shape: f32[1,1,1], index: 3, kind: output, shape index: {1}]  }
   0x1   :  { %10 = vsyncpa [#allocation4], 0 }
   0x2   :  { %11 = vsyncpa [#allocation7], 0  ;;  %s2318_s12 = smov [#allocation2]  }
   0x3   :  { %s17_s13 = sshll.u32 %s2318_s12, 4  ;;  %s18_s13 = int_to_ptr.vmem [resolvable:$true] %s17_s13 }
   0x4   :  { %s2260_s14 = scalar_lea.vmem %s18_s13, 4096  ;;  %p2265_p1 = scmp.lt.s32.totalorder %s18_s13, %s18_s13 }
   0x5   :  { %p2261_p0 = scmp.ne.s32.totalorder %s18_s13, %s2260_s14  ;;  %p2266_p2 = scmp.lt.s32.totalorder %s2260_s14, %s2260_s14 }
   0x7   :  { %p2267_p3 = por %p2266_p2, %p2265_p1 }
   0x9   :  { %p2268_p4 = pnand %p2267_p3, %p2261_p0 }
   0xb   :  { %2271 = shalt.err (!%p2268_p4)
}
   0xc   :  { %s2319_s15 = smov 128   ;;  %s2320_s16 = smov 8  }
   0xd   :  { %23 = dma.hbm_to_vmem [thread:$0]  %s4832_s0, 4096, %s18_s13, [#allocation3], %s2319_s15, %s2319_s15, %s2320_s16  }
   0xe   :  { %2312 = dma.done.wait [#allocation3], 4096  }
   0xf   :  { %2313 = vsyncadd [#allocation3], 4294963200  ;;  %v63_v0 = vld [vmem:[%s4833_s1 + $0x10] sm:$0xff]  ;;  %vm189_vm0 = vcmask 261120   ;;  %v61_v2 = vld [vmem:[%s4833_s1] sm:$0xff]  ;;  %s2322_s30 = smov 64  }
  0x10   :  { %v31_v1 = vld [vmem:[#allocation2 + $0x10] sm:$0xff]  ;;  %v2358_v3 = vmul.f32 %v63_v0, %v63_v0  ;;  %v2360_v5 = vmul.f32 %v61_v2, %v61_v2  ;;  %v29_v6 = vld [vmem:[#allocation2] sm:$0xff]  ;;  %v64_v7 = vld [vmem:[%s4833_s1 + $0x18] sm:$0xff]  ;;  %s2323_s4 = smov 32   ;;  %s2324_s5 = smov [#allocation5]  }
  0x11   :  { %v95_v4 = vadd.f32 %v63_v0, %v31_v1  ;;  %v32_v8 = vld [vmem:[#allocation2 + $0x18] sm:$0xff]  ;;  %v93_v9 = vadd.f32 %v61_v2, %v29_v6  ;;  %v2365_v10 = vmul.f32 %v64_v7, %v64_v7  ;;  %v62_v12 = vld [vmem:[%s4833_s1 + $0x8] sm:$0xff]  ;;  %v65_v20 = vld [vmem:[%s4833_s1 + $0x20] sm:$0xff]  ;;  %s1962_s6 = sshll.u32 %s2324_s5, 4  ;;  %s1963_s6 = int_to_ptr.vmem [resolvable:$true] %s1962_s6 }
  0x12   :  { %v96_v11 = vadd.f32 %v64_v7, %v32_v8  ;;  %v30_v13 = vld [vmem:[#allocation2 + $0x8] sm:$0xff]  ;;  %v196_v15 = vsel %vm189_vm0, %v2358_v3, 0.0  ;;  %v190_v16 = vsel %vm189_vm0, %v2360_v5, 0.0  ;;  %v2377_v17 = vmul.f32 %v62_v12, %v62_v12  ;;  %v33_v21 = vld [vmem:[#allocation2 + $0x20] sm:$0xff]  ;;  %v68_v25 = vld [vmem:[%s4833_s1 + $0x38] sm:$0xff]  ;;  %s2272_s7 = scalar_lea.vmem %s1963_s6, 4096  ;;  %p2277_p6 = scmp.lt.s32.totalorder %s1963_s6, %s1963_s6 }
  0x13   :  { %v66_v14 = vld [vmem:[%s4833_s1 + $0x28] sm:$0xff]  ;;  %127 = vst [vmem:[#allocation5 + $0x10] sm:$0xff] %v95_v4  ;;  %v94_v18 = vadd.f32 %v62_v12, %v30_v13  ;;  %197 = vadd.xlane.f32.xlu1 %v196_v15  ;;  %191 = vadd.xlane.f32.xlu0 %v190_v16  ;;  %125 = vst [vmem:[#allocation5] sm:$0xff] %v93_v9  ;;  %v199_v22 = vsel %vm189_vm0, %v2365_v10, 0.0  ;;  %v36_v26 = vld [vmem:[#allocation2 + $0x38] sm:$0xff]  ;;  %v2391_v28 = vmul.f32 %v65_v20, %v65_v20  ;;  %p2273_p5 = scmp.ne.s32.totalorder %s1963_s6, %s2272_s7  ;;  %p2278_p7 = scmp.lt.s32.totalorder %s2272_s7, %s2272_s7 }
  0x14   :  { %v34_v19 = vld [vmem:[#allocation2 + $0x28] sm:$0xff]  ;;  %128 = vst [vmem:[#allocation5 + $0x18] sm:$0xff] %v96_v11  ;;  %v2384_v23 = vmul.f32 %v66_v14, %v66_v14  ;;  %v193_v27 = vsel %vm189_vm0, %v2377_v17, 0.0  ;;  %v97_v29 = vadd.f32 %v65_v20, %v33_v21  ;;  %v100_v30 = vadd.f32 %v68_v25, %v36_v26  ;;  %v67_v31 = vld [vmem:[%s4833_s1 + $0x30] sm:$0xff]  ;;  %v69_v36 = vld [vmem:[%s4833_s1 + $0x40] sm:$0xff] }
  0x15   :  { %v98_v24 = vadd.f32 %v66_v14, %v34_v19  ;;  %126 = vst [vmem:[#allocation5 + $0x8] sm:$0xff] %v94_v18  ;;  %v35_v32 = vld [vmem:[#allocation2 + $0x30] sm:$0xff]  ;;  %v38_v33 = vld [vmem:[#allocation2 + $0x48] sm:$0xff]  ;;  %v37_v37 = vld [vmem:[#allocation2 + $0x40] sm:$0xff]  ;;  %v2405_v42 = vmul.f32 %v68_v25, %v68_v25  ;;  %v202_v48 = vsel %vm189_vm0, %v2391_v28, 0.0  ;;  %v2414_v49 = vmul.f32 %v67_v31, %v67_v31  ;;  %p2279_p8 = por %p2278_p7, %p2277_p6 }
  0x16   :  { %v99_v34 = vadd.f32 %v67_v31, %v35_v32  ;;  %v70_v35 = vld [vmem:[%s4833_s1 + $0x48] sm:$0xff]  ;;  %129 = vst [vmem:[#allocation5 + $0x20] sm:$0xff] %v97_v29  ;;  %132 = vst [vmem:[#allocation5 + $0x38] sm:$0xff] %v100_v30  ;;  %v72_v39 = vld [vmem:[%s4833_s1 + $0x58] sm:$0xff]  ;;  %v101_v43 = vadd.f32 %v69_v36, %v37_v37  ;;  %v205_v47 = vsel %vm189_vm0, %v2384_v23, 0.0  ;;  %v2456_v8 = vmul.f32 %v69_v36, %v69_v36 }
  0x17   :  { %130 = vst [vmem:[#allocation5 + $0x28] sm:$0xff] %v98_v24  ;;  %v102_v38 = vadd.f32 %v70_v35, %v38_v33  ;;  %v40_v40 = vld [vmem:[#allocation2 + $0x58] sm:$0xff]  ;;  %v39_v41 = vld [vmem:[#allocation2 + $0x50] sm:$0xff]  ;;  %200 = vadd.xlane.f32.xlu1 %v199_v22  ;;  %194 = vadd.xlane.f32.xlu0 %v193_v27  ;;  %v42_v46 = vld [vmem:[#allocation2 + $0x68] sm:$0xff]  ;;  %v2439_v63 = vmul.f32 %v70_v35, %v70_v35  ;;  %v211_v6 = vsel %vm189_vm0, %v2405_v42, 0.0  ;;  %v208_v7 = vsel %vm189_vm0, %v2414_v49, 0.0  ;;  %p2280_p9 = pnand %p2279_p8, %p2273_p5 }
  0x18   :  { %131 = vst [vmem:[#allocation5 + $0x30] sm:$0xff] %v99_v34  ;;  %v104_v44 = vadd.f32 %v72_v39, %v40_v40  ;;  %v71_v45 = vld [vmem:[%s4833_s1 + $0x50] sm:$0xff]  ;;  %v2419_v51 = vld [vmem:[%s4833_s1 + $0x68] sm:$0xff]  ;;  %v41_v52 = vld [vmem:[#allocation2 + $0x60] sm:$0xff]  ;;  %v2479_v25 = vmul.f32 %v72_v39, %v72_v39  ;;  %v214_v31 = vsel %vm189_vm0, %v2456_v8, 0.0 }
  0x19   :  { %134 = vst [vmem:[#allocation5 + $0x48] sm:$0xff] %v102_v38  ;;  %v103_v50 = vadd.f32 %v71_v45, %v39_v41  ;;  %v44_v53 = vld [vmem:[#allocation2 + $0x78] sm:$0xff]  ;;  %133 = vst [vmem:[#allocation5 + $0x40] sm:$0xff] %v101_v43  ;;  %v106_v54 = vadd.f32 %v2419_v51, %v42_v46  ;;  %v2425_v55 = vld [vmem:[%s4833_s1 + $0x60] sm:$0xff]  ;;  %v217_v24 = vsel %vm189_vm0, %v2439_v63, 0.0  ;;  %v2494_v32 = vmul.f32 %v71_v45, %v71_v45 }
  0x1a   :  { %136 = vst [vmem:[#allocation5 + $0x58] sm:$0xff] %v104_v44  ;;  %v2430_v56 = vld [vmem:[%s4833_s1 + $0x78] sm:$0xff]  ;;  %v43_v57 = vld [vmem:[#allocation2 + $0x70] sm:$0xff]  ;;  %v105_v58 = vadd.f32 %v2425_v55, %v41_v52  ;;  %v46_v61 = vld [vmem:[#allocation2 + $0x88] sm:$0xff]  ;;  %v223_v46 = vsel %vm189_vm0, %v2479_v25, 0.0 }
  0x1b   :  { %135 = vst [vmem:[#allocation5 + $0x50] sm:$0xff] %v103_v50  ;;  %v108_v59 = vadd.f32 %v2430_v56, %v44_v53  ;;  %v2437_v60 = vld [vmem:[%s4833_s1 + $0x70] sm:$0xff]  ;;  %v45_v62 = vld [vmem:[#allocation2 + $0x80] sm:$0xff]  ;;  %206 = vadd.xlane.f32.xlu1 %v205_v47  ;;  %203 = vadd.xlane.f32.xlu0 %v202_v48  ;;  %138 = vst [vmem:[#allocation5 + $0x68] sm:$0xff] %v106_v54  ;;  %v220_v54 = vsel %vm189_vm0, %v2494_v32, 0.0 }
  0x1c   :  { %v107_v0 = vadd.f32 %v2437_v60, %v43_v57  ;;  %v2445_v1 = vld [vmem:[%s4833_s1 + $0x88] sm:$0xff]  ;;  %v2450_v2 = vld [vmem:[%s4833_s1 + $0x80] sm:$0xff]  ;;  %v48_v4 = vld [vmem:[#allocation2 + $0x98] sm:$0xff]  ;;  %137 = vst [vmem:[#allocation5 + $0x60] sm:$0xff] %v105_v58  ;;  %v2533_v57 = vmul.f32 %v2419_v51, %v2419_v51  ;;  %v2537_v58 = vmul.f32 %v2425_v55, %v2425_v55 }
  0x1d   :  { %140 = vst [vmem:[#allocation5 + $0x78] sm:$0xff] %v108_v59  ;;  %v110_v9 = vadd.f32 %v2445_v1, %v46_v61  ;;  %v2462_v11 = vld [vmem:[%s4833_s1 + $0x98] sm:$0xff]  ;;  %v47_v12 = vld [vmem:[#allocation2 + $0x90] sm:$0xff]  ;;  %v50_v13 = vld [vmem:[#allocation2 + $0xa8] sm:$0xff]  ;;  %v109_v14 = vadd.f32 %v2450_v2, %v45_v62 }
  0x1e   :  { %139 = vst [vmem:[#allocation5 + $0x70] sm:$0xff] %v107_v0  ;;  %v112_v15 = vadd.f32 %v2462_v11, %v48_v4  ;;  %v2469_v16 = vld [vmem:[%s4833_s1 + $0x90] sm:$0xff]  ;;  %v49_v18 = vld [vmem:[#allocation2 + $0xa0] sm:$0xff]  ;;  %v2475_v20 = vld [vmem:[%s4833_s1 + $0xa8] sm:$0xff] }
  0x1f   :  { %142 = vst [vmem:[#allocation5 + $0x88] sm:$0xff] %v110_v9  ;;  %v111_v19 = vadd.f32 %v2469_v16, %v47_v12  ;;  %v52_v21 = vld [vmem:[#allocation2 + $0xb8] sm:$0xff]  ;;  %v51_v22 = vld [vmem:[#allocation2 + $0xb0] sm:$0xff]  ;;  %212 = vadd.xlane.f32.xlu1 %v211_v6  ;;  %209 = vadd.xlane.f32.xlu0 %v208_v7  ;;  %141 = vst [vmem:[#allocation5 + $0x80] sm:$0xff] %v109_v14  ;;  %v114_v26 = vadd.f32 %v2475_v20, %v50_v13  ;;  %v229_v12 = vsel %vm189_vm0, %v2533_v57, 0.0 }
  0x20   :  { %144 = vst [vmem:[#allocation5 + $0x98] sm:$0xff] %v112_v15  ;;  %v2485_v27 = vld [vmem:[%s4833_s1 + $0xa0] sm:$0xff]  ;;  %v2490_v29 = vld [vmem:[%s4833_s1 + $0xb8] sm:$0xff]  ;;  %v54_v30 = vld [vmem:[#allocation2 + $0xc8] sm:$0xff]  ;;  %v226_v13 = vsel %vm189_vm0, %v2537_v58, 0.0  ;;  %v2558_v14 = vmul.f32 %v2430_v56, %v2430_v56  ;;  %v2562_v15 = vmul.f32 %v2437_v60, %v2437_v60  ;;  %v2574_v56 = vmul.f32 %v2450_v2, %v2450_v2 }
  0x21   :  { %143 = vst [vmem:[#allocation5 + $0x90] sm:$0xff] %v111_v19  ;;  %v113_v33 = vadd.f32 %v2485_v27, %v49_v18  ;;  %v116_v34 = vadd.f32 %v2490_v29, %v52_v21  ;;  %v2501_v35 = vld [vmem:[%s4833_s1 + $0xb0] sm:$0xff]  ;;  %v53_v36 = vld [vmem:[#allocation2 + $0xc0] sm:$0xff]  ;;  %v56_v37 = vld [vmem:[#allocation2 + $0xd8] sm:$0xff]  ;;  %v2570_v21 = vmul.f32 %v2445_v1, %v2445_v1  ;;  %v2586_v1 = vmul.f32 %v2469_v16, %v2469_v16 }
  0x22   :  { %146 = vst [vmem:[#allocation5 + $0xa8] sm:$0xff] %v114_v26  ;;  %v115_v38 = vadd.f32 %v2501_v35, %v51_v22  ;;  %v2507_v39 = vld [vmem:[%s4833_s1 + $0xc8] sm:$0xff]  ;;  %v55_v40 = vld [vmem:[#allocation2 + $0xd0] sm:$0xff]  ;;  %v2513_v43 = vld [vmem:[%s4833_s1 + $0xc0] sm:$0xff]  ;;  %v235_v18 = vsel %vm189_vm0, %v2558_v14, 0.0  ;;  %v232_v19 = vsel %vm189_vm0, %v2562_v15, 0.0 }
  0x23   :  { %145 = vst [vmem:[#allocation5 + $0xa0] sm:$0xff] %v113_v33  ;;  %148 = vst [vmem:[#allocation5 + $0xb8] sm:$0xff] %v116_v34  ;;  %v118_v41 = vadd.f32 %v2507_v39, %v54_v30  ;;  %v2518_v44 = vld [vmem:[%s4833_s1 + $0xd8] sm:$0xff]  ;;  %v58_v45 = vld [vmem:[#allocation2 + $0xe8] sm:$0xff]  ;;  %218 = vadd.xlane.f32.xlu1 %v217_v24  ;;  %215 = vadd.xlane.f32.xlu0 %v214_v31  ;;  %v117_v47 = vadd.f32 %v2513_v43, %v53_v36  ;;  %v241_v60 = vsel %vm189_vm0, %v2570_v21, 0.0 }
  0x24   :  { %147 = vst [vmem:[#allocation5 + $0xb0] sm:$0xff] %v115_v38  ;;  %v120_v48 = vadd.f32 %v2518_v44, %v56_v37  ;;  %v2527_v50 = vld [vmem:[%s4833_s1 + $0xd0] sm:$0xff]  ;;  %v57_v52 = vld [vmem:[#allocation2 + $0xe0] sm:$0xff]  ;;  %v60_v53 = vld [vmem:[#allocation2 + $0xf8] sm:$0xff]  ;;  %v238_v22 = vsel %vm189_vm0, %v2574_v56, 0.0  ;;  %v2582_v24 = vmul.f32 %v2462_v11, %v2462_v11  ;;  %v244_v26 = vsel %vm189_vm0, %v2586_v1, 0.0 }
  0x25   :  { %150 = vst [vmem:[#allocation5 + $0xc8] sm:$0xff] %v118_v41  ;;  %v119_v59 = vadd.f32 %v2527_v50, %v55_v40  ;;  %v90_v61 = vld [vmem:[%s4833_s1 + $0xe8] sm:$0xff]  ;;  %v59_v62 = vld [vmem:[#allocation2 + $0xf0] sm:$0xff]  ;;  %149 = vst [vmem:[#allocation5 + $0xc0] sm:$0xff] %v117_v47  ;;  %v2594_v30 = vmul.f32 %v2475_v20, %v2475_v20  ;;  %v2598_v11 = vmul.f32 %v2485_v27, %v2485_v27 }
  0x26   :  { %152 = vst [vmem:[#allocation5 + $0xd8] sm:$0xff] %v120_v48  ;;  %v122_v0 = vadd.f32 %v90_v61, %v58_v45  ;;  %v89_v51 = vld [vmem:[%s4833_s1 + $0xe0] sm:$0xff]  ;;  %v92_v55 = vld [vmem:[%s4833_s1 + $0xf8] sm:$0xff]  ;;  %v91_v7 = vld [vmem:[%s4833_s1 + $0xf0] sm:$0xff]  ;;  %v247_v2 = vsel %vm189_vm0, %v2582_v24, 0.0  ;;  %v2606_v33 = vmul.f32 %v2490_v29, %v2490_v29  ;;  %v2610_v20 = vmul.f32 %v2501_v35, %v2501_v35  ;;  %s2321_s1 = smov 96  }
  0x27   :  { %151 = vst [vmem:[#allocation5 + $0xd0] sm:$0xff] %v119_v59  ;;  %v121_v4 = vadd.f32 %v89_v51, %v57_v52  ;;  %v124_v6 = vadd.f32 %v92_v55, %v60_v53  ;;  %224 = vadd.xlane.f32.xlu1 %v223_v46  ;;  %221 = vadd.xlane.f32.xlu0 %v220_v54  ;;  %v253_v16 = vsel %vm189_vm0, %v2594_v30, 0.0  ;;  %v250_v31 = vsel %vm189_vm0, %v2598_v11, 0.0 }
  0x28   :  { %154 = vst [vmem:[#allocation5 + $0xe8] sm:$0xff] %v122_v0  ;;  %v123_v9 = vadd.f32 %v91_v7, %v59_v62  ;;  %v259_v27 = vsel %vm189_vm0, %v2606_v33, 0.0  ;;  %v256_v34 = vsel %vm189_vm0, %v2610_v20, 0.0  ;;  %v2618_v36 = vmul.f32 %v2507_v39, %v2507_v39 }
  0x29   :  { %153 = vst [vmem:[#allocation5 + $0xe0] sm:$0xff] %v121_v4  ;;  %156 = vst [vmem:[#allocation5 + $0xf8] sm:$0xff] %v124_v6  ;;  %v2622_v29 = vmul.f32 %v2513_v43, %v2513_v43  ;;  %v2630_v38 = vmul.f32 %v2518_v44, %v2518_v44  ;;  %v2634_v39 = vmul.f32 %v2527_v50, %v2527_v50 }
  0x2a   :  { %155 = vst [vmem:[#allocation5 + $0xf0] sm:$0xff] %v123_v9  ;;  %v265_v35 = vsel %vm189_vm0, %v2618_v36, 0.0  ;;  %v2640_v43 = vmul.f32 %v90_v61, %v90_v61  ;;  %v2642_v45 = vmul.f32 %v89_v51, %v89_v51  ;;  %v2648_v47 = vmul.f32 %v92_v55, %v92_v55 }
  0x2b   :  { %230 = vadd.xlane.f32.xlu1 %v229_v12  ;;  %227 = vadd.xlane.f32.xlu0 %v226_v13  ;;  %v262_v37 = vsel %vm189_vm0, %v2622_v29, 0.0  ;;  %v271_v40 = vsel %vm189_vm0, %v2630_v38, 0.0  ;;  %v268_v41 = vsel %vm189_vm0, %v2634_v39, 0.0  ;;  %v2650_v48 = vmul.f32 %v91_v7, %v91_v7 }
  0x2c   :  { %v277_v44 = vsel %vm189_vm0, %v2640_v43, 0.0  ;;  %v274_v46 = vsel %vm189_vm0, %v2642_v45, 0.0  ;;  %v283_v50 = vsel %vm189_vm0, %v2648_v47, 0.0 }
  0x2d   :  { %v280_v52 = vsel %vm189_vm0, %v2650_v48, 0.0 }
  0x2f   :  { %236 = vadd.xlane.f32.xlu1 %v235_v18  ;;  %233 = vadd.xlane.f32.xlu0 %v232_v19 }
  0x33   :  { %242 = vadd.xlane.f32.xlu1 %v241_v60  ;;  %239 = vadd.xlane.f32.xlu0 %v238_v22 }
  0x37   :  { %248 = vadd.xlane.f32.xlu1 %v247_v2  ;;  %245 = vadd.xlane.f32.xlu0 %v244_v26 }
  0x3b   :  { %254 = vadd.xlane.f32.xlu1 %v253_v16  ;;  %251 = vadd.xlane.f32.xlu0 %v250_v31 }
  0x3f   :  { %260 = vadd.xlane.f32.xlu1 %v259_v27  ;;  %257 = vadd.xlane.f32.xlu0 %v256_v34 }
  0x43   :  { %266 = vadd.xlane.f32.xlu1 %v265_v35  ;;  %263 = vadd.xlane.f32.xlu0 %v262_v37 }
  0x47   :  { %272 = vadd.xlane.f32.xlu1 %v271_v40  ;;  %269 = vadd.xlane.f32.xlu0 %v268_v41 }
  0x4b   :  { %278 = vadd.xlane.f32.xlu1 %v277_v44  ;;  %275 = vadd.xlane.f32.xlu0 %v274_v46 }
  0x4f   :  { %284 = vadd.xlane.f32.xlu1 %v283_v50  ;;  %281 = vadd.xlane.f32.xlu0 %v280_v52 }
  0x60   :  { %576 = vrot.lane.b32.xlu1 %v2377_v17, %s2321_s1 }
  0x64   :  { %578 = vrot.lane.b32.xlu1 %v2358_v3, %s2321_s1 }
  0x65   :  { %574 = vrot.lane.b32.xlu0 %v2360_v5, %s2321_s1 }
  0x68   :  { %580 = vrot.lane.b32.xlu1 %v2365_v10, %s2321_s1 }
  0x69   :  { %582 = vrot.lane.b32.xlu0 %v2391_v28, %s2321_s1 }
  0x6c   :  { %584 = vrot.lane.b32.xlu1 %v2384_v23, %s2321_s1 }
  0x6d   :  { %586 = vrot.lane.b32.xlu0 %v2414_v49, %s2321_s1 }
  0x70   :  { %588 = vrot.lane.b32.xlu1 %v2405_v42, %s2321_s1 }
  0x71   :  { %590 = vrot.lane.b32.xlu0 %v2456_v8, %s2321_s1 }
  0x74   :  { %592 = vrot.lane.b32.xlu1 %v2439_v63, %s2321_s1 }
  0x75   :  { %594 = vrot.lane.b32.xlu0 %v2494_v32, %s2321_s1 }
  0x78   :  { %596 = vrot.lane.b32.xlu1 %v2479_v25, %s2321_s1 }
  0x79   :  { %598 = vrot.lane.b32.xlu0 %v2537_v58, %s2321_s1 }
  0x7c   :  { %600 = vrot.lane.b32.xlu1 %v2533_v57, %s2321_s1 }
  0x7d   :  { %602 = vrot.lane.b32.xlu0 %v2562_v15, %s2321_s1 }
  0x80   :  { %604 = vrot.lane.b32.xlu1 %v2558_v14, %s2321_s1 }
  0x81   :  { %606 = vrot.lane.b32.xlu0 %v2574_v56, %s2321_s1 }
  0x84   :  { %608 = vrot.lane.b32.xlu1 %v2570_v21, %s2321_s1 }
  0x85   :  { %610 = vrot.lane.b32.xlu0 %v2586_v1, %s2321_s1 }
  0x88   :  { %612 = vrot.lane.b32.xlu1 %v2582_v24, %s2321_s1 }
  0x89   :  { %614 = vrot.lane.b32.xlu0 %v2598_v11, %s2321_s1 }
  0x8c   :  { %616 = vrot.lane.b32.xlu1 %v2594_v30, %s2321_s1 }
  0x8d   :  { %618 = vrot.lane.b32.xlu0 %v2610_v20, %s2321_s1 }
  0x90   :  { %620 = vrot.lane.b32.xlu1 %v2606_v33, %s2321_s1 }
  0x91   :  { %622 = vrot.lane.b32.xlu0 %v2622_v29, %s2321_s1 }
  0x94   :  { %624 = vrot.lane.b32.xlu1 %v2618_v36, %s2321_s1 }
  0x95   :  { %626 = vrot.lane.b32.xlu0 %v2634_v39, %s2321_s1 }
  0x98   :  { %628 = vrot.lane.b32.xlu1 %v2630_v38, %s2321_s1 }
  0x99   :  { %630 = vrot.lane.b32.xlu0 %v2642_v45, %s2321_s1 }
  0x9c   :  { %v2714_v53 = vpop.xlane.xlu1 %197  ;;  %v2716_v54 = vpop.xlane.xlu0 %191  ;;  %632 = vrot.lane.b32.xlu1 %v2640_v43, %s2321_s1 }
  0x9d   :  { %634 = vrot.lane.b32.xlu0 %v2650_v48, %s2321_s1  ;;  %1996 = vrsqrt.f32 %v2714_v53  ;;  %vm302_vm1 = vcmp.eq.f32.partialorder %v2714_v53, inf  ;;  %vm304_vm2 = vcmp.eq.f32.partialorder %v2714_v53, 0.0  ;;  %vm288_vm3 = vcmp.eq.f32.partialorder %v2716_v54, inf }
  0x9e   :  { %1998 = vrsqrt.f32 %v2716_v54  ;;  %vm290_vm4 = vcmp.eq.f32.partialorder %v2716_v54, 0.0 }
  0xa0   :  { %v2722_v59 = vpop.xlane.xlu1 %200  ;;  %v2724_v61 = vpop.xlane.xlu0 %194  ;;  %636 = vrot.lane.b32.xlu1 %v2648_v47, %s2321_s1 }
  0xa1   :  { %2000 = vrsqrt.f32 %v2722_v59  ;;  %vm309_vm5 = vcmp.eq.f32.partialorder %v2722_v59, inf  ;;  %vm311_vm6 = vcmp.eq.f32.partialorder %v2722_v59, 0.0  ;;  %vm295_vm7 = vcmp.eq.f32.partialorder %v2724_v61, inf }
  0xa2   :  { %2002 = vrsqrt.f32 %v2724_v61  ;;  %vm297_vm8 = vcmp.eq.f32.partialorder %v2724_v61, 0.0 }
  0xa4   :  { %v2728_v62 = vpop.xlane.xlu1 %206  ;;  %v2730_v0 = vpop.xlane.xlu0 %203 }
  0xa5   :  { %2004 = vrsqrt.f32 %v2728_v62  ;;  %vm323_vm9 = vcmp.eq.f32.partialorder %v2728_v62, inf  ;;  %vm316_vm10 = vcmp.eq.f32.partialorder %v2730_v0, inf  ;;  %vm325_vm11 = vcmp.eq.f32.partialorder %v2728_v62, 0.0 }
  0xa6   :  { %2006 = vrsqrt.f32 %v2730_v0  ;;  %vm318_vm12 = vcmp.eq.f32.partialorder %v2730_v0, 0.0 }
  0xa8   :  { %v2732_v51 = vpop.xlane.xlu1 %212  ;;  %v2734_v55 = vpop.xlane.xlu0 %209 }
  0xa9   :  { %2008 = vrsqrt.f32 %v2732_v51  ;;  %vm337_vm13 = vcmp.eq.f32.partialorder %v2732_v51, inf  ;;  %vm330_vm14 = vcmp.eq.f32.partialorder %v2734_v55, inf }
  0xaa   :  { %2010 = vrsqrt.f32 %v2734_v55 }
  0xac   :  { %v2736_v4 = vpop.xlane.xlu1 %218  ;;  %v2738_v6 = vpop.xlane.xlu0 %215 }
  0xad   :  { %2012 = vrsqrt.f32 %v2736_v4  ;;  %vm351_vm15 = vcmp.eq.f32.partialorder %v2736_v4, inf }
  0xae   :  { %2014 = vrsqrt.f32 %v2738_v6 }
  0xb0   :  { %v2740_v7 = vpop.xlane.xlu1 %224  ;;  %v2742_v9 = vpop.xlane.xlu0 %221 }
  0xb1   :  { %2016 = vrsqrt.f32 %v2740_v7 }
  0xb2   :  { %2018 = vrsqrt.f32 %v2742_v9 }
  0xb4   :  { %v2744_v12 = vpop.xlane.xlu1 %230  ;;  %v2746_v13 = vpop.xlane.xlu0 %227 }
  0xb5   :  { %2020 = vrsqrt.f32 %v2744_v12 }
  0xb6   :  { %2022 = vrsqrt.f32 %v2746_v13 }
  0xb8   :  { %v2748_v18 = vpop.xlane.xlu1 %236  ;;  %v2750_v19 = vpop.xlane.xlu0 %233 }
  0xb9   :  { %2024 = vrsqrt.f32 %v2748_v18 }
  0xba   :  { %2026 = vrsqrt.f32 %v2750_v19 }
  0xbc   :  { %v2752_v60 = vpop.xlane.xlu1 %242  ;;  %v2754_v22 = vpop.xlane.xlu0 %239 }
  0xc0   :  { %v2756_v2 = vpop.xlane.xlu1 %248  ;;  %v2758_v26 = vpop.xlane.xlu0 %245 }
  0xc1   :  { %4873 = vst [vmem:[#allocation11_spill] sm:$0xff] %v2758_v26 }
  0xc4   :  { %v2760_v16 = vpop.xlane.xlu1 %254  ;;  %v2762_v31 = vpop.xlane.xlu0 %251 }
  0xc5   :  { %4874 = vst [vmem:[#allocation12_spill] sm:$0xff] %v2760_v16  ;;  %4875 = vst [vmem:[#allocation13_spill] sm:$0xff] %v2762_v31 }
  0xc8   :  { %v2764_v27 = vpop.xlane.xlu1 %260  ;;  %v2766_v34 = vpop.xlane.xlu0 %257 }
  0xc9   :  { %4876 = vst [vmem:[#allocation14_spill] sm:$0xff] %v2764_v27  ;;  %4877 = vst [vmem:[#allocation15_spill] sm:$0xff] %v2766_v34 }
  0xcc   :  { %v2768_v35 = vpop.xlane.xlu1 %266  ;;  %v2770_v37 = vpop.xlane.xlu0 %263 }
  0xcd   :  { %4878 = vst [vmem:[#allocation16_spill] sm:$0xff] %v2768_v35  ;;  %4879 = vst [vmem:[#allocation17_spill] sm:$0xff] %v2770_v37 }
  0xd0   :  { %v2772_v40 = vpop.xlane.xlu1 %272  ;;  %v2774_v41 = vpop.xlane.xlu0 %269 }
  0xd1   :  { %4880 = vst [vmem:[#allocation18_spill] sm:$0xff] %v2772_v40  ;;  %4881 = vst [vmem:[#allocation19_spill] sm:$0xff] %v2774_v41 }
  0xd4   :  { %v2776_v44 = vpop.xlane.xlu1 %278  ;;  %v2778_v46 = vpop.xlane.xlu0 %275 }
  0xd5   :  { %4882 = vst [vmem:[#allocation20_spill] sm:$0xff] %v2776_v44  ;;  %4883 = vst [vmem:[#allocation21_spill] sm:$0xff] %v2778_v46 }
  0xd8   :  { %v2780_v50 = vpop.xlane.xlu1 %284  ;;  %v2782_v52 = vpop.xlane.xlu0 %281 }
  0xd9   :  { %4884 = vst [vmem:[#allocation22_spill] sm:$0xff] %v2780_v50  ;;  %4885 = vst [vmem:[#allocation23_spill] sm:$0xff] %v2782_v52 }
  0xdc   :  { %v577_v31 = vpop.permute.xlu1 %576  ;;  %v575_v27 = vpop.permute.xlu0 %574 }
  0xdd   :  { %v673_v34 = vsel %vm189_vm0, %v577_v31, 0.0  ;;  %v670_v35 = vsel %vm189_vm0, %v575_v27, 0.0 }
  0xde   :  { %674 = vadd.xlane.f32.xlu1 %v673_v34  ;;  %671 = vadd.xlane.f32.xlu0 %v670_v35 }
  0xe0   :  { %v579_v37 = vpop.permute.xlu1 %578  ;;  %v583_v40 = vpop.permute.xlu0 %582 }
  0xe1   :  { %v676_v41 = vsel %vm189_vm0, %v579_v37, 0.0  ;;  %v682_v52 = vsel %vm189_vm0, %v583_v40, 0.0 }
  0xe2   :  { %677 = vadd.xlane.f32.xlu0 %v676_v41 }
  0xe4   :  { %v581_v44 = vpop.permute.xlu1 %580  ;;  %v587_v16 = vpop.permute.xlu0 %586 }
  0xe5   :  { %v679_v46 = vsel %vm189_vm0, %v581_v44, 0.0  ;;  %v688_v27 = vsel %vm189_vm0, %v587_v16, 0.0 }
  0xe6   :  { %680 = vadd.xlane.f32.xlu0 %v679_v46 }
  0xe8   :  { %v585_v50 = vpop.permute.xlu1 %584  ;;  %v591_v26 = vpop.permute.xlu0 %590 }
  0xe9   :  { %v685_v31 = vsel %vm189_vm0, %v585_v50, 0.0  ;;  %v694_v41 = vsel %vm189_vm0, %v591_v26, 0.0 }
  0xea   :  { %686 = vadd.xlane.f32.xlu1 %v685_v31  ;;  %683 = vadd.xlane.f32.xlu0 %v682_v52 }
  0xec   :  { %v589_v34 = vpop.permute.xlu1 %588  ;;  %v595_v35 = vpop.permute.xlu0 %594 }
  0xed   :  { %v691_v37 = vsel %vm189_vm0, %v589_v34, 0.0  ;;  %v700_v50 = vsel %vm189_vm0, %v595_v35, 0.0 }
  0xee   :  { %692 = vadd.xlane.f32.xlu1 %v691_v37  ;;  %689 = vadd.xlane.f32.xlu0 %v688_v27 }
  0xf0   :  { %v593_v44 = vpop.permute.xlu1 %592  ;;  %v599_v46 = vpop.permute.xlu0 %598 }
  0xf1   :  { %v697_v40 = vsel %vm189_vm0, %v593_v44, 0.0  ;;  %v706_v34 = vsel %vm189_vm0, %v599_v46, 0.0 }
  0xf2   :  { %698 = vadd.xlane.f32.xlu1 %v697_v40  ;;  %695 = vadd.xlane.f32.xlu0 %v694_v41 }
  0xf4   :  { %v597_v31 = vpop.permute.xlu1 %596  ;;  %v603_v52 = vpop.permute.xlu0 %602 }
  0xf5   :  { %v703_v16 = vsel %vm189_vm0, %v597_v31, 0.0  ;;  %v712_v44 = vsel %vm189_vm0, %v603_v52, 0.0 }
  0xf6   :  { %704 = vadd.xlane.f32.xlu1 %v703_v16  ;;  %701 = vadd.xlane.f32.xlu0 %v700_v50 }
  0xf8   :  { %v601_v37 = vpop.permute.xlu1 %600  ;;  %v607_v27 = vpop.permute.xlu0 %606 }
  0xf9   :  { %v709_v26 = vsel %vm189_vm0, %v601_v37, 0.0  ;;  %v718_v31 = vsel %vm189_vm0, %v607_v27, 0.0 }
  0xfa   :  { %710 = vadd.xlane.f32.xlu1 %v709_v26  ;;  %707 = vadd.xlane.f32.xlu0 %v706_v34 }
  0xfc   :  { %v605_v40 = vpop.permute.xlu1 %604  ;;  %v611_v41 = vpop.permute.xlu0 %610 }
  0xfd   :  { %v715_v35 = vsel %vm189_vm0, %v605_v40, 0.0  ;;  %v724_v37 = vsel %vm189_vm0, %v611_v41, 0.0 }
  0xfe   :  { %716 = vadd.xlane.f32.xlu1 %v715_v35  ;;  %713 = vadd.xlane.f32.xlu0 %v712_v44 }
 0x100   :  { %v609_v16 = vpop.permute.xlu1 %608  ;;  %v615_v50 = vpop.permute.xlu0 %614 }
 0x101   :  { %v721_v46 = vsel %vm189_vm0, %v609_v16, 0.0  ;;  %v730_v40 = vsel %vm189_vm0, %v615_v50, 0.0 }
 0x102   :  { %722 = vadd.xlane.f32.xlu1 %v721_v46  ;;  %719 = vadd.xlane.f32.xlu0 %v718_v31 }
 0x104   :  { %v613_v26 = vpop.permute.xlu1 %612  ;;  %v619_v34 = vpop.permute.xlu0 %618 }
 0x105   :  { %v727_v52 = vsel %vm189_vm0, %v613_v26, 0.0  ;;  %v736_v16 = vsel %vm189_vm0, %v619_v34, 0.0 }
 0x106   :  { %728 = vadd.xlane.f32.xlu1 %v727_v52  ;;  %725 = vadd.xlane.f32.xlu0 %v724_v37 }
 0x108   :  { %v617_v35 = vpop.permute.xlu1 %616  ;;  %v623_v44 = vpop.permute.xlu0 %622 }
 0x109   :  { %v733_v27 = vsel %vm189_vm0, %v617_v35, 0.0  ;;  %v742_v26 = vsel %vm189_vm0, %v623_v44, 0.0 }
 0x10a   :  { %734 = vadd.xlane.f32.xlu1 %v733_v27  ;;  %731 = vadd.xlane.f32.xlu0 %v730_v40 }
 0x10c   :  { %v621_v46 = vpop.permute.xlu1 %620  ;;  %v627_v31 = vpop.permute.xlu0 %626 }
 0x10d   :  { %v739_v41 = vsel %vm189_vm0, %v621_v46, 0.0  ;;  %v748_v35 = vsel %vm189_vm0, %v627_v31, 0.0 }
 0x10e   :  { %740 = vadd.xlane.f32.xlu1 %v739_v41  ;;  %737 = vadd.xlane.f32.xlu0 %v736_v16 }
 0x110   :  { %v625_v52 = vpop.permute.xlu1 %624  ;;  %v631_v50 = vpop.permute.xlu0 %630 }
 0x111   :  { %v745_v37 = vsel %vm189_vm0, %v625_v52, 0.0  ;;  %v754_v34 = vsel %vm189_vm0, %v631_v50, 0.0 }
 0x112   :  { %746 = vadd.xlane.f32.xlu1 %v745_v37  ;;  %743 = vadd.xlane.f32.xlu0 %v742_v26 }
 0x114   :  { %v629_v27 = vpop.permute.xlu1 %628  ;;  %v635_v41 = vpop.permute.xlu0 %634 }
 0x115   :  { %v751_v40 = vsel %vm189_vm0, %v629_v27, 0.0  ;;  %v760_v44 = vsel %vm189_vm0, %v635_v41, 0.0 }
 0x116   :  { %752 = vadd.xlane.f32.xlu1 %v751_v40  ;;  %749 = vadd.xlane.f32.xlu0 %v748_v35 }
 0x118   :  { %v633_v46 = vpop.permute.xlu1 %632 }
 0x119   :  { %v757_v16 = vsel %vm189_vm0, %v633_v46, 0.0 }
 0x11a   :  { %758 = vadd.xlane.f32.xlu1 %v757_v16  ;;  %755 = vadd.xlane.f32.xlu0 %v754_v34 }
 0x11c   :  { %v637_v52 = vpop.permute.xlu1 %636 }
 0x11d   :  { %v763_v26 = vsel %vm189_vm0, %v637_v52, 0.0 }
 0x11e   :  { %764 = vadd.xlane.f32.xlu1 %v763_v26  ;;  %761 = vadd.xlane.f32.xlu0 %v760_v44 }
 0x12f   :  { %1024 = vrot.lane.b32.xlu1 %v2377_v17, %s2322_s30 }
 0x133   :  { %1026 = vrot.lane.b32.xlu1 %v2358_v3, %s2322_s30 }
 0x134   :  { %1022 = vrot.lane.b32.xlu0 %v2360_v5, %s2322_s30 }
 0x137   :  { %1028 = vrot.lane.b32.xlu1 %v2365_v10, %s2322_s30 }
 0x138   :  { %1030 = vrot.lane.b32.xlu0 %v2391_v28, %s2322_s30 }
 0x13b   :  { %1032 = vrot.lane.b32.xlu1 %v2384_v23, %s2322_s30 }
 0x13c   :  { %1034 = vrot.lane.b32.xlu0 %v2414_v49, %s2322_s30 }
 0x13f   :  { %1036 = vrot.lane.b32.xlu1 %v2405_v42, %s2322_s30 }
 0x140   :  { %1038 = vrot.lane.b32.xlu0 %v2456_v8, %s2322_s30 }
 0x143   :  { %1040 = vrot.lane.b32.xlu1 %v2439_v63, %s2322_s30 }
 0x144   :  { %1042 = vrot.lane.b32.xlu0 %v2494_v32, %s2322_s30 }
 0x147   :  { %1044 = vrot.lane.b32.xlu1 %v2479_v25, %s2322_s30 }
 0x148   :  { %1046 = vrot.lane.b32.xlu0 %v2537_v58, %s2322_s30 }
 0x14b   :  { %1048 = vrot.lane.b32.xlu1 %v2533_v57, %s2322_s30 }
 0x14c   :  { %1050 = vrot.lane.b32.xlu0 %v2562_v15, %s2322_s30 }
 0x14f   :  { %1052 = vrot.lane.b32.xlu1 %v2558_v14, %s2322_s30 }
 0x150   :  { %1054 = vrot.lane.b32.xlu0 %v2574_v56, %s2322_s30 }
 0x153   :  { %1056 = vrot.lane.b32.xlu1 %v2570_v21, %s2322_s30 }
 0x154   :  { %1058 = vrot.lane.b32.xlu0 %v2586_v1, %s2322_s30 }
 0x157   :  { %1060 = vrot.lane.b32.xlu1 %v2582_v24, %s2322_s30 }
 0x158   :  { %1062 = vrot.lane.b32.xlu0 %v2598_v11, %s2322_s30 }
 0x15b   :  { %1064 = vrot.lane.b32.xlu1 %v2594_v30, %s2322_s30 }
 0x15c   :  { %1066 = vrot.lane.b32.xlu0 %v2610_v20, %s2322_s30 }
 0x15f   :  { %1068 = vrot.lane.b32.xlu1 %v2606_v33, %s2322_s30 }
 0x160   :  { %1070 = vrot.lane.b32.xlu0 %v2622_v29, %s2322_s30 }
 0x163   :  { %1072 = vrot.lane.b32.xlu1 %v2618_v36, %s2322_s30 }
 0x164   :  { %1074 = vrot.lane.b32.xlu0 %v2634_v39, %s2322_s30 }
 0x167   :  { %1076 = vrot.lane.b32.xlu1 %v2630_v38, %s2322_s30  ;;  %v2872_v31 = vpop.xlane.xlu0 %671  ;;  %v2882_v50 = vpop.xlane.xlu1 %674 }
 0x168   :  { %1078 = vrot.lane.b32.xlu0 %v2642_v45, %s2322_s30 }
 0x16b   :  { %1080 = vrot.lane.b32.xlu1 %v2640_v43, %s2322_s30  ;;  %v2878_v37 = vpop.xlane.xlu0 %677 }
 0x16c   :  { %1082 = vrot.lane.b32.xlu0 %v2650_v48, %s2322_s30 }
 0x16f   :  { %1084 = vrot.lane.b32.xlu1 %v2648_v47, %s2322_s30  ;;  %v2886_v35 = vpop.xlane.xlu0 %680 }
 0x173   :  { %v2888_v27 = vpop.xlane.xlu1 %686  ;;  %1470 = vrot.lane.b32.xlu1 %v2360_v5, %s2323_s4  ;;  %v2892_v40 = vpop.xlane.xlu0 %683 }
 0x177   :  { %v2894_v34 = vpop.xlane.xlu1 %692  ;;  %1472 = vrot.lane.b32.xlu1 %v2377_v17, %s2323_s4  ;;  %v2898_v46 = vpop.xlane.xlu0 %689 }
 0x17b   :  { %v2900_v41 = vpop.xlane.xlu1 %698  ;;  %1474 = vrot.lane.b32.xlu1 %v2358_v3, %s2323_s4  ;;  %v2904_v16 = vpop.xlane.xlu0 %695 }
 0x17c   :  { %4886 = vst [vmem:[#allocation24_spill] sm:$0xff] %v2900_v41  ;;  %4887 = vst [vmem:[#allocation25_spill] sm:$0xff] %v2904_v16 }
 0x17f   :  { %v2906_v44 = vpop.xlane.xlu1 %704  ;;  %1476 = vrot.lane.b32.xlu1 %v2365_v10, %s2323_s4  ;;  %v2910_v5 = vpop.xlane.xlu0 %701 }
 0x180   :  { %4888 = vst [vmem:[#allocation26_spill] sm:$0xff] %v2906_v44  ;;  %4889 = vst [vmem:[#allocation27_spill] sm:$0xff] %v2910_v5 }
 0x183   :  { %v2912_v52 = vpop.xlane.xlu1 %710  ;;  %1478 = vrot.lane.b32.xlu1 %v2391_v28, %s2323_s4  ;;  %v2916_v17 = vpop.xlane.xlu0 %707 }
 0x184   :  { %4890 = vst [vmem:[#allocation28_spill] sm:$0xff] %v2912_v52  ;;  %4891 = vst [vmem:[#allocation29_spill] sm:$0xff] %v2916_v17 }
 0x187   :  { %v2918_v26 = vpop.xlane.xlu1 %716  ;;  %1480 = vrot.lane.b32.xlu1 %v2384_v23, %s2323_s4  ;;  %v2922_v3 = vpop.xlane.xlu0 %713 }
 0x188   :  { %4892 = vst [vmem:[#allocation30_spill] sm:$0xff] %v2918_v26  ;;  %4893 = vst [vmem:[#allocation31_spill] sm:$0xff] %v2922_v3 }
 0x18b   :  { %v2924_v44 = vpop.xlane.xlu1 %722  ;;  %1482 = vrot.lane.b32.xlu1 %v2414_v49, %s2323_s4  ;;  %v2928_v10 = vpop.xlane.xlu0 %719 }
 0x18c   :  { %4894 = vst [vmem:[#allocation32_spill] sm:$0xff] %v2924_v44  ;;  %4895 = vst [vmem:[#allocation33_spill] sm:$0xff] %v2928_v10 }
 0x18f   :  { %v2930_v52 = vpop.xlane.xlu1 %728  ;;  %1486 = vrot.lane.b32.xlu1 %v2456_v8, %s2323_s4  ;;  %v2934_v28 = vpop.xlane.xlu0 %725 }
 0x190   :  { %4896 = vst [vmem:[#allocation34_spill] sm:$0xff] %v2930_v52  ;;  %4897 = vst [vmem:[#allocation35_spill] sm:$0xff] %v2934_v28 }
 0x193   :  { %v2936_v26 = vpop.xlane.xlu1 %734  ;;  %1488 = vrot.lane.b32.xlu1 %v2439_v63, %s2323_s4  ;;  %v2940_v23 = vpop.xlane.xlu0 %731 }
 0x194   :  { %4898 = vst [vmem:[#allocation36_spill] sm:$0xff] %v2936_v26  ;;  %4899 = vst [vmem:[#allocation37_spill] sm:$0xff] %v2940_v23 }
 0x197   :  { %v2942_v44 = vpop.xlane.xlu1 %740  ;;  %1490 = vrot.lane.b32.xlu1 %v2494_v32, %s2323_s4  ;;  %v2946_v49 = vpop.xlane.xlu0 %737 }
 0x198   :  { %4900 = vst [vmem:[#allocation38_spill] sm:$0xff] %v2942_v44  ;;  %4901 = vst [vmem:[#allocation39_spill] sm:$0xff] %v2946_v49 }
 0x19b   :  { %v2948_v52 = vpop.xlane.xlu1 %746  ;;  %1492 = vrot.lane.b32.xlu1 %v2479_v25, %s2323_s4  ;;  %v2952_v8 = vpop.xlane.xlu0 %743 }
 0x19c   :  { %4902 = vst [vmem:[#allocation40_spill] sm:$0xff] %v2948_v52  ;;  %4903 = vst [vmem:[#allocation41_spill] sm:$0xff] %v2952_v8 }
 0x19f   :  { %v2954_v26 = vpop.xlane.xlu1 %752  ;;  %1494 = vrot.lane.b32.xlu1 %v2537_v58, %s2323_s4  ;;  %v2958_v63 = vpop.xlane.xlu0 %749 }
 0x1a0   :  { %4904 = vst [vmem:[#allocation42_spill] sm:$0xff] %v2954_v26  ;;  %4905 = vst [vmem:[#allocation43_spill] sm:$0xff] %v2958_v63 }
 0x1a3   :  { %v2960_v44 = vpop.xlane.xlu1 %758  ;;  %1496 = vrot.lane.b32.xlu1 %v2533_v57, %s2323_s4  ;;  %v2964_v32 = vpop.xlane.xlu0 %755 }
 0x1a4   :  { %4906 = vst [vmem:[#allocation44_spill] sm:$0xff] %v2960_v44  ;;  %4907 = vst [vmem:[#allocation45_spill] sm:$0xff] %v2964_v32 }
 0x1a7   :  { %v2966_v52 = vpop.xlane.xlu1 %764  ;;  %1500 = vrot.lane.b32.xlu1 %v2558_v14, %s2323_s4  ;;  %v2970_v25 = vpop.xlane.xlu0 %761 }
 0x1a8   :  { %4908 = vst [vmem:[#allocation46_spill] sm:$0xff] %v2966_v52  ;;  %4909 = vst [vmem:[#allocation47_spill] sm:$0xff] %v2970_v25 }
 0x1ab   :  { %v1025_v26 = vpop.permute.xlu1 %1024  ;;  %1504 = vrot.lane.b32.xlu1 %v2570_v21, %s2323_s4  ;;  %v1023_v58 = vpop.permute.xlu0 %1022 }
 0x1ac   :  { %v1118_v63 = vsel %vm189_vm0, %v1023_v58, 0.0 }
 0x1ad   :  { %1119 = vadd.xlane.f32.xlu0 %v1118_v63 }
 0x1af   :  { %v1027_v44 = vpop.permute.xlu1 %1026  ;;  %1508 = vrot.lane.b32.xlu1 %v2582_v24, %s2323_s4 }
 0x1b3   :  { %v1029_v57 = vpop.permute.xlu1 %1028  ;;  %1512 = vrot.lane.b32.xlu1 %v2594_v30, %s2323_s4 }
 0x1b7   :  { %v1033_v52 = vpop.permute.xlu1 %1032  ;;  %1516 = vrot.lane.b32.xlu1 %v2606_v33, %s2323_s4 }
 0x1bb   :  { %v2981_v14 = vpop.permute.xlu1 %1036  ;;  %1520 = vrot.lane.b32.xlu1 %v2618_v36, %s2323_s4 }
 0x1bf   :  { %v2985_v21 = vpop.permute.xlu1 %1040  ;;  %1524 = vrot.lane.b32.xlu1 %v2630_v38, %s2323_s4 }
 0x1c3   :  { %v2989_v63 = vpop.permute.xlu1 %1044  ;;  %1528 = vrot.lane.b32.xlu1 %v2640_v43, %s2323_s4  ;;  %1484 = vrot.lane.b32.xlu0 %v2405_v42, %s2323_s4 }
 0x1c7   :  { %v2995_v24 = vpop.permute.xlu1 %1048  ;;  %1530 = vrot.lane.b32.xlu1 %v2650_v48, %s2323_s4  ;;  %1498 = vrot.lane.b32.xlu0 %v2562_v15, %s2323_s4 }
 0x1cb   :  { %v3001_v30 = vpop.permute.xlu1 %1052  ;;  %1502 = vrot.lane.b32.xlu0 %v2574_v56, %s2323_s4 }
 0x1cf   :  { %v3005_v33 = vpop.permute.xlu1 %1056  ;;  %1506 = vrot.lane.b32.xlu0 %v2586_v1, %s2323_s4 }
 0x1d3   :  { %v3009_v36 = vpop.permute.xlu1 %1060  ;;  %1510 = vrot.lane.b32.xlu0 %v2598_v11, %s2323_s4  ;;  %v1031_v11 = vpop.permute.xlu0 %1030 }
 0x1d4   :  { %v1130_v28 = vsel %vm189_vm0, %v1031_v11, 0.0 }
 0x1d7   :  { %v3013_v42 = vpop.permute.xlu1 %1064  ;;  %1514 = vrot.lane.b32.xlu0 %v2610_v20, %s2323_s4  ;;  %v1035_v43 = vpop.permute.xlu0 %1034  ;;  %v1124_v20 = vsel %vm189_vm0, %v1027_v44, 0.0 }
 0x1db   :  { %v3017_v15 = vpop.permute.xlu1 %1068  ;;  %1518 = vrot.lane.b32.xlu0 %v2622_v29, %s2323_s4  ;;  %v1127_v29 = vsel %vm189_vm0, %v1029_v57, 0.0  ;;  %v1039_v25 = vpop.permute.xlu0 %1038  ;;  %v1121_v57 = vsel %vm189_vm0, %v1025_v26, 0.0 }
 0x1df   :  { %v3021_v56 = vpop.permute.xlu1 %1072  ;;  %1522 = vrot.lane.b32.xlu0 %v2634_v39, %s2323_s4  ;;  %v1043_v32 = vpop.permute.xlu0 %1042 }
 0x1e0   :  { %v1148_v16 = vsel %vm189_vm0, %v1043_v32, 0.0 }
 0x1e3   :  { %v3025_v1 = vpop.permute.xlu1 %1076  ;;  %1526 = vrot.lane.b32.xlu0 %v2642_v45, %s2323_s4  ;;  %v3036_v23 = vpop.permute.xlu0 %1046 }
 0x1e7   :  { %v3029_v38 = vpop.permute.xlu1 %1080 }
 0x1e8   :  { %4910 = vst [vmem:[#allocation48_spill] sm:$0xff] %v3029_v38 }
 0x1eb   :  { %v3032_v48 = vpop.permute.xlu1 %1084  ;;  %1125 = vadd.xlane.f32.xlu1 %v1124_v20 }
 0x1ec   :  { %4911 = vst [vmem:[#allocation49_spill] sm:$0xff] %v3032_v48 }
 0x1ef   :  { %1128 = vadd.xlane.f32.xlu1 %v1127_v29  ;;  %v1471_v58 = vpop.permute.xlu1 %1470  ;;  %v3041_v29 = vpop.permute.xlu0 %1050 }
 0x1f0   :  { %v1566_v10 = vsel %vm189_vm0, %v1471_v58, 0.0 }
 0x1f3   :  { %v1473_v39 = vpop.permute.xlu1 %1472  ;;  %v3046_v11 = vpop.permute.xlu0 %1054 }
 0x1f7   :  { %v1475_v8 = vpop.permute.xlu1 %1474 }
 0x1f8   :  { %v1572_v49 = vsel %vm189_vm0, %v1475_v8, 0.0  ;;  %v1133_v8 = vsel %vm189_vm0, %v1033_v52, 0.0  ;;  %v1139_v52 = vsel %vm189_vm0, %v2981_v14, 0.0 }
 0x1f9   :  { %1573 = vadd.xlane.f32.xlu1 %v1572_v49  ;;  %v1569_v49 = vsel %vm189_vm0, %v1473_v39, 0.0  ;;  %v1142_v39 = vsel %vm189_vm0, %v1039_v25, 0.0 }
 0x1fb   :  { %v1477_v45 = vpop.permute.xlu1 %1476 }
 0x1fc   :  { %v1575_v44 = vsel %vm189_vm0, %v1477_v45, 0.0  ;;  %v3050_v45 = vpop.permute.xlu0 %1058 }
 0x1fd   :  { %1131 = vadd.xlane.f32.xlu1 %v1130_v28  ;;  %v1136_v28 = vsel %vm189_vm0, %v1035_v43, 0.0 }
 0x1ff   :  { %v1479_v20 = vpop.permute.xlu1 %1478 }
 0x200   :  { %v3055_v58 = vpop.permute.xlu0 %1062  ;;  %v1578_v5 = vsel %vm189_vm0, %v1479_v20, 0.0  ;;  %v1157_v20 = vsel %vm189_vm0, %v2995_v24, 0.0 }
 0x201   :  { %1576 = vadd.xlane.f32.xlu1 %v1575_v44 }
 0x202   :  { %1122 = vadd.xlane.f32.xlu0 %v1121_v57 }
 0x203   :  { %v1481_v3 = vpop.permute.xlu1 %1480 }
 0x204   :  { %v1581_v26 = vsel %vm189_vm0, %v1481_v3, 0.0  ;;  %v3058_v43 = vpop.permute.xlu0 %1066 }
 0x205   :  { %1134 = vadd.xlane.f32.xlu1 %v1133_v8 }
 0x206   :  { %1567 = vadd.xlane.f32.xlu0 %v1566_v10 }
 0x207   :  { %v1483_v44 = vpop.permute.xlu1 %1482 }
 0x208   :  { %v1584_v10 = vsel %vm189_vm0, %v1483_v44, 0.0  ;;  %v3060_v3 = vpop.permute.xlu0 %1070 }
 0x209   :  { %1137 = vadd.xlane.f32.xlu1 %v1136_v28 }
 0x20a   :  { %1570 = vadd.xlane.f32.xlu0 %v1569_v49 }
 0x20b   :  { %v1487_v57 = vpop.permute.xlu1 %1486 }
 0x20c   :  { %v3064_v49 = vpop.permute.xlu0 %1074 }
 0x20d   :  { %1582 = vadd.xlane.f32.xlu1 %v1581_v26 }
 0x20f   :  { %v1489_v8 = vpop.permute.xlu1 %1488 }
 0x210   :  { %v3066_v28 = vpop.permute.xlu0 %1078 }
 0x211   :  { %1140 = vadd.xlane.f32.xlu1 %v1139_v52 }
 0x213   :  { %v1491_v14 = vpop.permute.xlu1 %1490 }
 0x214   :  { %v3068_v44 = vpop.permute.xlu0 %1082  ;;  %v1596_v32 = vsel %vm189_vm0, %v1491_v14, 0.0 }
 0x215   :  { %1585 = vadd.xlane.f32.xlu1 %v1584_v10  ;;  %4912 = vst [vmem:[#allocation50_spill] sm:$0xff] %v3068_v44  ;;  %v1590_v44 = vsel %vm189_vm0, %v1487_v57, 0.0 }
 0x217   :  { %v1493_v26 = vpop.permute.xlu1 %1492 }
 0x218   :  { %v1599_v57 = vsel %vm189_vm0, %v1493_v26, 0.0  ;;  %v305_v26 = vand.u32 2147483648, %v2714_v53 }
 0x219   :  { %1143 = vadd.xlane.f32.xlu1 %v1142_v39 }
 0x21b   :  { %v1495_v52 = vpop.permute.xlu1 %1494 }
 0x21c   :  { %v1602_v14 = vsel %vm189_vm0, %v1495_v52, 0.0 }
 0x21f   :  { %v1497_v17 = vpop.permute.xlu1 %1496 }
 0x220   :  { %1532 = vrot.lane.b32.xlu0 %v2648_v47, %s2323_s4  ;;  %v1145_v47 = vsel %vm189_vm0, %v2985_v21, 0.0 }
 0x223   :  { %v3077_v48 = vpop.permute.xlu1 %1500 }
 0x227   :  { %v3086_v21 = vpop.permute.xlu1 %1504 }
 0x236   :  { %v3070_v25 = vpop.xlane.xlu0 %1119 }
 0x23a   :  { %v1485_v10 = vpop.permute.xlu0 %1484 }
 0x23b   :  { %v1587_v39 = vsel %vm189_vm0, %v1485_v10, 0.0  ;;  %v1151_v10 = vsel %vm189_vm0, %v2989_v63, 0.0  ;;  %v3094_v63 = vpop.permute.xlu1 %1508 }
 0x23c   :  { %1588 = vadd.xlane.f32.xlu1 %v1587_v39 }
 0x23f   :  { %1579 = vadd.xlane.f32.xlu0 %v1578_v5  ;;  %v1593_v5 = vsel %vm189_vm0, %v1489_v8, 0.0  ;;  %v1997_v8 = vpop.eup %1996  ;;  %2028 = vrsqrt.f32 %v2752_v60 }
 0x240   :  { %1146 = vadd.xlane.f32.xlu1 %v1145_v47  ;;  %v1999_v24 = vpop.eup %1998  ;;  %v301_v52 = vmul.f32 %v1997_v8, %v2714_v53  ;;  %v1163_v47 = vsel %vm189_vm0, %v3001_v30, 0.0  ;;  %2030 = vrsqrt.f32 %v2754_v22 }
 0x241   :  { %v2001_v39 = vpop.eup %2000  ;;  %2032 = vrsqrt.f32 %v2756_v2 }
 0x243   :  { %1149 = vadd.xlane.f32.xlu0 %v1148_v16  ;;  %v1154_v16 = vsel %vm189_vm0, %v3036_v23, 0.0  ;;  %v1160_v23 = vsel %vm189_vm0, %v3041_v29, 0.0  ;;  %v291_v29 = vand.u32 2147483648, %v2716_v54 }
 0x244   :  { %1591 = vadd.xlane.f32.xlu1 %v1590_v44  ;;  %v3110_v44 = vpop.permute.xlu1 %1512 }
 0x247   :  { %1152 = vadd.xlane.f32.xlu0 %v1151_v10  ;;  %v2003_v10 = vpop.eup %2002 }
 0x248   :  { %1594 = vadd.xlane.f32.xlu1 %v1593_v5  ;;  %v287_v5 = vmul.f32 %v1999_v24, %v2716_v54  ;;  %v2005_v30 = vpop.eup %2004  ;;  %v303_v24 = vsel %vm302_vm1, %v2714_v53, %v301_v52  ;;  %vm339_vm1 = vcmp.eq.f32.partialorder %v2732_v51, 0.0  ;;  %v1169_v53 = vsel %vm189_vm0, %v3005_v33, 0.0 }
 0x249   :  { %v322_v8 = vmul.f32 %v2005_v30, %v2728_v62  ;;  %v3159_v52 = vsel %vm304_vm2, %v305_v26, %v303_v24  ;;  %vm332_vm2 = vcmp.eq.f32.partialorder %v2734_v55, 0.0 }
 0x24b   :  { %1155 = vadd.xlane.f32.xlu0 %v1154_v16  ;;  %v312_v16 = vand.u32 2147483648, %v2722_v59  ;;  %v324_v33 = vsel %vm323_vm9, %v2728_v62, %v322_v8  ;;  %vm360_vm9 = vcmp.eq.f32.partialorder %v2742_v9, 0.0 }
 0x24c   :  { %1597 = vadd.xlane.f32.xlu1 %v1596_v32  ;;  %v1605_v32 = vsel %vm189_vm0, %v1497_v17, 0.0  ;;  %v2007_v17 = vpop.eup %2006 }
 0x24d   :  { %v2009_v41 = vpop.eup %2008  ;;  %v315_v38 = vmul.f32 %v2007_v17, %v2730_v0 }
 0x24f   :  { %1158 = vadd.xlane.f32.xlu0 %v1157_v20  ;;  %v308_v20 = vmul.f32 %v2001_v39, %v2722_v59  ;;  %v294_v39 = vmul.f32 %v2003_v10, %v2724_v61 }
 0x250   :  { %1600 = vadd.xlane.f32.xlu1 %v1599_v57  ;;  %v298_v57 = vand.u32 2147483648, %v2724_v61 }
 0x251   :  { %v296_v30 = vsel %vm295_vm7, %v2724_v61, %v294_v39  ;;  %vm346_vm7 = vcmp.eq.f32.partialorder %v2738_v6, 0.0  ;;  %v1172_v61 = vsel %vm189_vm0, %v3050_v45, 0.0 }
 0x252   :  { %v3197_v39 = vsel %vm297_vm8, %v298_v57, %v296_v30  ;;  %v4913_v30 = vand.u32 2147483648, %v2728_v62  ;;  %vm367_vm8 = vcmp.eq.f32.partialorder %v2740_v7, 0.0 }
 0x253   :  { %1161 = vadd.xlane.f32.xlu0 %v1160_v23  ;;  %v1499_v23 = vpop.permute.xlu0 %1498 }
 0x254   :  { %1603 = vadd.xlane.f32.xlu1 %v1602_v14  ;;  %v289_v14 = vsel %vm288_vm3, %v2716_v54, %v287_v5  ;;  %v1608_v10 = vsel %vm189_vm0, %v1499_v23, 0.0  ;;  %v333_v5 = vand.u32 2147483648, %v2734_v55  ;;  %v354_v23 = vand.u32 2147483648, %v2736_v4 }
 0x255   :  { %vm344_vm3 = vcmp.eq.f32.partialorder %v2738_v6, inf  ;;  %v347_v54 = vand.u32 2147483648, %v2738_v6 }
 0x257   :  { %1164 = vadd.xlane.f32.xlu0 %v1163_v47  ;;  %v1166_v47 = vsel %vm189_vm0, %v3046_v11, 0.0  ;;  %v310_v11 = vsel %vm309_vm5, %v2722_v59, %v308_v20  ;;  %v3166_v20 = vsel %vm290_vm4, %v291_v29, %v289_v14  ;;  %v1611_v29 = vsel %vm189_vm0, %v3077_v48, 0.0  ;;  %v1503_v14 = vpop.permute.xlu0 %1502 }
 0x258   :  { %1606 = vadd.xlane.f32.xlu1 %v1605_v32  ;;  %v3141_v32 = vpop.permute.xlu1 %1516  ;;  %v3177_v17 = vsel %vm311_vm6, %v312_v16, %v310_v11  ;;  %v336_v59 = vmul.f32 %v2009_v41, %v2732_v51  ;;  %vm353_vm4 = vcmp.eq.f32.partialorder %v2736_v4, 0.0  ;;  %vm365_vm5 = vcmp.eq.f32.partialorder %v2740_v7, inf }
 0x259   :  { %v317_v41 = vsel %vm316_vm10, %v2730_v0, %v315_v38  ;;  %vm358_vm6 = vcmp.eq.f32.partialorder %v2742_v9, inf  ;;  %v3214_v38 = vsel %vm325_vm11, %v4913_v30, %v324_v33  ;;  %vm379_vm10 = vcmp.eq.f32.partialorder %v2744_v12, inf  ;;  %v4916_v30 = vld [vmem:[#allocation12_spill] sm:$0xff] }
 0x25a   :  { %v338_v62 = vsel %vm337_vm13, %v2732_v51, %v336_v59  ;;  %vm372_vm11 = vcmp.eq.f32.partialorder %v2746_v13, inf  ;;  %vm381_vm13 = vcmp.eq.f32.partialorder %v2744_v12, 0.0 }
 0x25b   :  { %1167 = vadd.xlane.f32.xlu0 %v1166_v47  ;;  %v2011_v47 = vpop.eup %2010 }
 0x25c   :  { %1609 = vadd.xlane.f32.xlu1 %v1608_v10  ;;  %v2013_v26 = vpop.eup %2012  ;;  %v3193_v24 = vpop.permute.xlu1 %1520  ;;  %v329_v8 = vmul.f32 %v2011_v47, %v2734_v55 }
 0x25d   :  { %v2015_v48 = vpop.eup %2014  ;;  %v350_v11 = vmul.f32 %v2013_v26, %v2736_v4  ;;  %v4914_v26 = vld [vmem:[#allocation11_spill] sm:$0xff] }
 0x25e   :  { %v2017_v10 = vpop.eup %2016  ;;  %2034 = vrsqrt.f32 %v4914_v26  ;;  %v343_v33 = vmul.f32 %v2015_v48, %v2738_v6 }
 0x25f   :  { %1170 = vadd.xlane.f32.xlu0 %v1169_v53  ;;  %v2019_v57 = vpop.eup %2018  ;;  %v4915_v53 = vand.u32 2147483648, %v2730_v0  ;;  %2036 = vrsqrt.f32 %v4916_v30  ;;  %v364_v0 = vmul.f32 %v2017_v10, %v2740_v7  ;;  %v352_v48 = vsel %vm351_vm15, %v2736_v4, %v350_v11 }
 0x260   :  { %1612 = vadd.xlane.f32.xlu1 %v1611_v29  ;;  %v1614_v29 = vsel %vm189_vm0, %v1503_v14, 0.0  ;;  %v331_v14 = vsel %vm330_vm14, %v2734_v55, %v329_v8  ;;  %v2021_v59 = vpop.eup %2020  ;;  %v1175_v8 = vsel %vm189_vm0, %v3009_v36, 0.0  ;;  %v4918_v10 = vand.u32 2147483648, %v2732_v51 }
 0x261   :  { %v3224_v45 = vsel %vm318_vm12, %v4915_v53, %v317_v41  ;;  %v4917_v41 = vld [vmem:[#allocation13_spill] sm:$0xff]  ;;  %v357_v53 = vmul.f32 %v2019_v57, %v2742_v9  ;;  %v2023_v47 = vpop.eup %2022  ;;  %vm393_vm12 = vcmp.eq.f32.partialorder %v2748_v18, inf  ;;  %v1617_v57 = vsel %vm189_vm0, %v3086_v21, 0.0  ;;  %v1507_v21 = vpop.permute.xlu0 %1506 }
 0x262   :  { %2038 = vrsqrt.f32 %v4917_v41  ;;  %v3252_v16 = vsel %vm339_vm1, %v4918_v10, %v338_v62  ;;  %v3262_v36 = vsel %vm332_vm2, %v333_v5, %v331_v14  ;;  %v345_v51 = vsel %vm344_vm3, %v2738_v6, %v343_v33  ;;  %v4919_v10 = vld [vmem:[#allocation14_spill] sm:$0xff]  ;;  %v4921_v14 = vld [vmem:[#allocation15_spill] sm:$0xff]  ;;  %v4923_v62 = vld [vmem:[#allocation16_spill] sm:$0xff] }
 0x263   :  { %1173 = vadd.xlane.f32.xlu0 %v1172_v61  ;;  %v2025_v61 = vpop.eup %2024  ;;  %vm374_vm14 = vcmp.eq.f32.partialorder %v2746_v13, 0.0  ;;  %2040 = vrsqrt.f32 %v4919_v10  ;;  %v3275_v55 = vsel %vm353_vm4, %v354_v23, %v352_v48  ;;  %v366_v5 = vsel %vm365_vm5, %v2740_v7, %v364_v0 }
 0x264   :  { %1615 = vadd.xlane.f32.xlu1 %v1614_v29  ;;  %v3244_v29 = vpop.permute.xlu1 %1524  ;;  %4920 = vst [vmem:[#allocation11_spill] sm:$0xff] %v3275_v55  ;;  %v378_v33 = vmul.f32 %v2021_v59, %v2744_v12  ;;  %vm395_vm15 = vcmp.eq.f32.partialorder %v2748_v18, 0.0  ;;  %vm386_vm1 = vcmp.eq.f32.partialorder %v2750_v19, inf  ;;  %2042 = vrsqrt.f32 %v4921_v14  ;;  %v2027_v59 = vpop.eup %2026  ;;  %v4932_v55 = vld [vmem:[#allocation21_spill] sm:$0xff] }
 0x265   :  { %v371_v4 = vmul.f32 %v2023_v47, %v2746_v13  ;;  %vm407_vm2 = vcmp.eq.f32.partialorder %v2752_v60, inf  ;;  %v1178_v0 = vsel %vm189_vm0, %v3055_v58, 0.0  ;;  %v3296_v48 = vsel %vm346_vm7, %v347_v54, %v345_v51  ;;  %v4926_v54 = vld [vmem:[#allocation17_spill] sm:$0xff]  ;;  %v1511_v11 = vpop.permute.xlu0 %1510 }
 0x266   :  { %4922 = vst [vmem:[#allocation12_spill] sm:$0xff] %v3296_v48  ;;  %2044 = vrsqrt.f32 %v4923_v62  ;;  %v1620_v47 = vsel %vm189_vm0, %v1507_v21, 0.0  ;;  %v4924_v23 = vand.u32 2147483648, %v2740_v7  ;;  %vm388_vm3 = vcmp.eq.f32.partialorder %v2750_v19, 0.0 }
 0x267   :  { %1176 = vadd.xlane.f32.xlu0 %v1175_v8  ;;  %v359_v8 = vsel %vm358_vm6, %v2742_v9, %v357_v53  ;;  %v2029_v53 = vpop.eup %2028  ;;  %vm400_vm4 = vcmp.eq.f32.partialorder %v2754_v22, inf  ;;  %2046 = vrsqrt.f32 %v4926_v54  ;;  %v4927_v21 = vand.u32 2147483648, %v2742_v9  ;;  %v4930_v9 = vld [vmem:[#allocation19_spill] sm:$0xff] }
 0x268   :  { %1618 = vadd.xlane.f32.xlu1 %v1617_v57  ;;  %v392_v57 = vmul.f32 %v2025_v61, %v2748_v18  ;;  %v3305_v58 = vsel %vm367_vm8, %v4924_v23, %v366_v5  ;;  %v3311_v61 = vpop.permute.xlu1 %1528  ;;  %v2031_v51 = vpop.eup %2030  ;;  %v380_v7 = vsel %vm379_vm10, %v2744_v12, %v378_v33  ;;  %vm409_vm5 = vcmp.eq.f32.partialorder %v2752_v60, 0.0  ;;  %v4929_v23 = vld [vmem:[#allocation18_spill] sm:$0xff] }
 0x269   :  { %4925 = vst [vmem:[#allocation13_spill] sm:$0xff] %v3305_v58  ;;  %2048 = vrsqrt.f32 %v4929_v23  ;;  %v385_v6 = vmul.f32 %v2027_v59, %v2750_v19  ;;  %vm402_vm6 = vcmp.eq.f32.partialorder %v2754_v22, 0.0  ;;  %vm421_vm7 = vcmp.eq.f32.partialorder %v2756_v2, inf }
 0x26a   :  { %2050 = vrsqrt.f32 %v4930_v9  ;;  %v1181_v33 = vsel %vm189_vm0, %v3013_v42, 0.0  ;;  %v406_v5 = vmul.f32 %v2029_v53, %v2752_v60  ;;  %vm414_vm8 = vcmp.eq.f32.partialorder %v4914_v26, inf }
 0x26b   :  { %1179 = vadd.xlane.f32.xlu0 %v1178_v0  ;;  %v3317_v0 = vsel %vm360_vm9, %v4927_v21, %v359_v8  ;;  %v2033_v8 = vpop.eup %2032  ;;  %v394_v21 = vsel %vm393_vm12, %v2748_v18, %v392_v57  ;;  %v1623_v59 = vsel %vm189_vm0, %v3094_v63, 0.0  ;;  %vm435_vm9 = vcmp.eq.f32.partialorder %v4916_v30, inf }
 0x26c   :  { %1621 = vadd.xlane.f32.xlu1 %v1620_v47  ;;  %4928 = vst [vmem:[#allocation14_spill] sm:$0xff] %v3317_v0  ;;  %v373_v47 = vsel %vm372_vm11, %v2746_v13, %v371_v4  ;;  %v4931_v4 = vld [vmem:[#allocation20_spill] sm:$0xff]  ;;  %v2035_v58 = vpop.eup %2034  ;;  %v399_v0 = vmul.f32 %v2031_v51, %v2754_v22  ;;  %v4933_v53 = vand.u32 2147483648, %v2744_v12  ;;  %v4935_v63 = vand.u32 2147483648, %v2746_v13 }
 0x26d   :  { %2052 = vrsqrt.f32 %v4931_v4  ;;  %v2037_v57 = vpop.eup %2036  ;;  %vm423_vm10 = vcmp.eq.f32.partialorder %v2756_v2, 0.0  ;;  %vm428_vm11 = vcmp.eq.f32.partialorder %v4917_v41, inf  ;;  %v4936_v42 = vand.u32 2147483648, %v2748_v18 }
 0x26e   :  { %2054 = vrsqrt.f32 %v4932_v55  ;;  %v3350_v48 = vsel %vm381_vm13, %v4933_v53, %v380_v7  ;;  %v387_v7 = vsel %vm386_vm1, %v2750_v19, %v385_v6  ;;  %vm416_vm12 = vcmp.eq.f32.partialorder %v4914_v26, 0.0  ;;  %v3374_v53 = vpop.permute.xlu1 %1530  ;;  %v4938_v6 = vld [vmem:[#allocation22_spill] sm:$0xff] }
 0x26f   :  { %1182 = vadd.xlane.f32.xlu0 %v1181_v33  ;;  %4934 = vst [vmem:[#allocation15_spill] sm:$0xff] %v3350_v48  ;;  %v3356_v33 = vsel %vm374_vm14, %v4935_v63, %v373_v47  ;;  %v3365_v12 = vsel %vm395_vm15, %v4936_v42, %v394_v21  ;;  %v1184_v47 = vsel %vm189_vm0, %v3058_v43, 0.0  ;;  %v408_v63 = vsel %vm407_vm2, %v2752_v60, %v406_v5  ;;  %v4939_v5 = vld [vmem:[#allocation23_spill] sm:$0xff] }
 0x270   :  { %1624 = vadd.xlane.f32.xlu1 %v1623_v59  ;;  %v2039_v59 = vpop.eup %2038  ;;  %4937 = vst [vmem:[#allocation16_spill] sm:$0xff] %v3365_v12  ;;  %v420_v18 = vmul.f32 %v2033_v8, %v2756_v2  ;;  %vm437_vm13 = vcmp.eq.f32.partialorder %v4916_v30, 0.0  ;;  %vm430_vm14 = vcmp.eq.f32.partialorder %v4917_v41, 0.0  ;;  %2056 = vrsqrt.f32 %v4938_v6 }
 0x271   :  { %v1626_v21 = vsel %vm189_vm0, %v1511_v11, 0.0  ;;  %v401_v43 = vsel %vm400_vm4, %v2754_v22, %v399_v0  ;;  %v413_v42 = vmul.f32 %v2035_v58, %v4914_v26  ;;  %v434_v13 = vmul.f32 %v2037_v57, %v4916_v30  ;;  %v2041_v8 = vpop.eup %2040  ;;  %v1515_v58 = vpop.permute.xlu0 %1514 }
 0x272   :  { %vm449_vm15 = vcmp.eq.f32.partialorder %v4919_v10, inf  ;;  %2058 = vrsqrt.f32 %v4939_v5  ;;  %v4940_v51 = vand.u32 2147483648, %v2750_v19  ;;  %vm442_vm1 = vcmp.eq.f32.partialorder %v4921_v14, inf  ;;  %v2043_v57 = vpop.eup %2042 }
 0x273   :  { %1185 = vadd.xlane.f32.xlu0 %v1184_v47  ;;  %v427_v47 = vmul.f32 %v2039_v59, %v4917_v41  ;;  %v4941_v12 = vand.u32 2147483648, %v2752_v60  ;;  %v1187_v59 = vsel %vm189_vm0, %v3017_v15, 0.0  ;;  %v422_v60 = vsel %vm421_vm7, %v2756_v2, %v420_v18 }
 0x274   :  { %1627 = vadd.xlane.f32.xlu1 %v1626_v21  ;;  %v3395_v11 = vsel %vm388_vm3, %v4940_v51, %v387_v7  ;;  %v3408_v51 = vpop.xlane.xlu1 %1125  ;;  %v4942_v7 = vand.u32 2147483648, %v2754_v22  ;;  %2060 = vrsqrt.f32 %v2878_v37  ;;  %v415_v15 = vsel %vm414_vm8, %v4914_v26, %v413_v42 }
 0x275   :  { %v3404_v21 = vsel %vm409_vm5, %v4941_v12, %v408_v63  ;;  %v1629_v12 = vsel %vm189_vm0, %v3110_v44, 0.0  ;;  %v2045_v63 = vpop.eup %2044  ;;  %v436_v22 = vsel %vm435_vm9, %v4916_v30, %v434_v13  ;;  %vm451_vm2 = vcmp.eq.f32.partialorder %v4919_v10, 0.0 }
 0x276   :  { %v3416_v0 = vsel %vm402_vm6, %v4942_v7, %v401_v43  ;;  %vm444_vm3 = vcmp.eq.f32.partialorder %v4921_v14, 0.0  ;;  %2062 = vrsqrt.f32 %v2882_v50  ;;  %v2047_v44 = vpop.eup %2046  ;;  %v429_v43 = vsel %vm428_vm11, %v4917_v41, %v427_v47 }
 0x277   :  { %1188 = vadd.xlane.f32.xlu0 %v1187_v59  ;;  %v448_v42 = vmul.f32 %v2041_v8, %v4919_v10  ;;  %v441_v59 = vmul.f32 %v2043_v57, %v4921_v14  ;;  %vm463_vm4 = vcmp.eq.f32.partialorder %v4923_v62, inf  ;;  %vm456_vm5 = vcmp.eq.f32.partialorder %v4926_v54, inf  ;;  %v2049_v13 = vpop.eup %2048 }
 0x278   :  { %1630 = vadd.xlane.f32.xlu1 %v1629_v12  ;;  %2064 = vrsqrt.f32 %v3408_v51  ;;  %v4943_v7 = vand.u32 2147483648, %v2756_v2  ;;  %vm477_vm6 = vcmp.eq.f32.partialorder %v4929_v23, inf  ;;  %v1190_v8 = vsel %vm189_vm0, %v3060_v3, 0.0  ;;  %v2051_v57 = vpop.eup %2050 }
 0x279   :  { %v4945_v18 = vand.u32 2147483648, %v4914_v26  ;;  %vm470_vm7 = vcmp.eq.f32.partialorder %v4930_v9, inf  ;;  %v4946_v47 = vand.u32 2147483648, %v4916_v30  ;;  %vm465_vm8 = vcmp.eq.f32.partialorder %v4923_v62, 0.0 }
 0x27a   :  { %v3446_v12 = vsel %vm423_vm10, %v4943_v7, %v422_v60  ;;  %v1632_v60 = vsel %vm189_vm0, %v1515_v58, 0.0  ;;  %v1519_v7 = vpop.permute.xlu0 %1518  ;;  %v2053_v48 = vpop.eup %2052  ;;  %vm458_vm9 = vcmp.eq.f32.partialorder %v4926_v54, 0.0  ;;  %vm491_vm10 = vcmp.eq.f32.partialorder %v4931_v4, inf }
 0x27b   :  { %4944 = vst [vmem:[#allocation17_spill] sm:$0xff] %v3446_v12  ;;  %v3456_v19 = vsel %vm416_vm12, %v4945_v18, %v415_v15  ;;  %1191 = vadd.xlane.f32.xlu0 %v1190_v8  ;;  %v3465_v3 = vsel %vm437_vm13, %v4946_v47, %v436_v22  ;;  %v4947_v12 = vand.u32 2147483648, %v4917_v41  ;;  %v494_v58 = vand.u32 2147483648, %v4931_v4  ;;  %v2055_v15 = vpop.eup %2054 }
 0x27c   :  { %1633 = vadd.xlane.f32.xlu1 %v1632_v60  ;;  %v450_v30 = vsel %vm449_vm15, %v4919_v10, %v448_v42  ;;  %v443_v41 = vsel %vm442_vm1, %v4921_v14, %v441_v59  ;;  %vm479_vm11 = vcmp.eq.f32.partialorder %v4929_v23, 0.0  ;;  %vm472_vm12 = vcmp.eq.f32.partialorder %v4930_v9, 0.0  ;;  %v3491_v42 = vpop.xlane.xlu1 %1128 }
 0x27d   :  { %v3471_v26 = vsel %vm430_vm14, %v4947_v12, %v429_v43  ;;  %vm484_vm13 = vcmp.eq.f32.partialorder %v4932_v55, inf  ;;  %2066 = vrsqrt.f32 %v2872_v31  ;;  %v462_v22 = vmul.f32 %v2045_v63, %v4923_v62 }
 0x27e   :  { %v455_v18 = vmul.f32 %v2047_v44, %v4926_v54  ;;  %v476_v43 = vmul.f32 %v2049_v13, %v4929_v23  ;;  %vm493_vm14 = vcmp.eq.f32.partialorder %v4931_v4, 0.0  ;;  %v1193_v59 = vsel %vm189_vm0, %v3021_v56, 0.0  ;;  %v2057_v44 = vpop.eup %2056 }
 0x27f   :  { %v469_v12 = vmul.f32 %v2051_v57, %v4930_v9  ;;  %v490_v47 = vmul.f32 %v2053_v48, %v4931_v4  ;;  %2068 = vrsqrt.f32 %v2886_v35  ;;  %v1635_v63 = vsel %vm189_vm0, %v3141_v32, 0.0  ;;  %1194 = vadd.xlane.f32.xlu0 %v1193_v59  ;;  %v2059_v56 = vpop.eup %2058  ;;  %v1523_v59 = vpop.permute.xlu0 %1522 }
 0x280   :  { %v483_v13 = vmul.f32 %v2055_v15, %v4932_v55  ;;  %vm486_vm15 = vcmp.eq.f32.partialorder %v4932_v55, 0.0  ;;  %v487_v8 = vand.u32 2147483648, %v4932_v55  ;;  %vm505_vm1 = vcmp.eq.f32.partialorder %v4938_v6, inf  ;;  %1636 = vadd.xlane.f32.xlu1 %v1635_v63 }
 0x281   :  { %v4948_v57 = vand.u32 2147483648, %v4919_v10  ;;  %v4949_v32 = vand.u32 2147483648, %v4921_v14  ;;  %2070 = vrsqrt.f32 %v3491_v42  ;;  %v464_v63 = vsel %vm463_vm4, %v4923_v62, %v462_v22 }
 0x282   :  { %v457_v10 = vsel %vm456_vm5, %v4926_v54, %v455_v18  ;;  %v1196_v14 = vsel %vm189_vm0, %v3064_v49, 0.0  ;;  %v492_v22 = vsel %vm491_vm10, %v4931_v4, %v490_v47  ;;  %v2061_v18 = vpop.eup %2060  ;;  %v485_v49 = vsel %vm484_vm13, %v4932_v55, %v483_v13 }
 0x283   :  { %v3508_v48 = vsel %vm451_vm2, %v4948_v57, %v450_v30  ;;  %v3514_v60 = vsel %vm444_vm3, %v4949_v32, %v443_v41  ;;  %v478_v30 = vsel %vm477_vm6, %v4929_v23, %v476_v43  ;;  %v3529_v41 = vpop.xlane.xlu1 %1573  ;;  %v471_v57 = vsel %vm470_vm7, %v4930_v9, %v469_v12  ;;  %1197 = vadd.xlane.f32.xlu0 %v1196_v14  ;;  %v2063_v12 = vpop.eup %2062 }
 0x284   :  { %v1638_v32 = vsel %vm189_vm0, %v1519_v7, 0.0  ;;  %2072 = vrsqrt.f32 %v3529_v41  ;;  %v504_v43 = vmul.f32 %v2057_v44, %v4938_v6  ;;  %v497_v15 = vmul.f32 %v2059_v56, %v4939_v5  ;;  %v4954_v44 = vld [vmem:[#allocation48_spill] sm:$0xff] }
 0x285   :  { %2074 = vrsqrt.f32 %v3070_v25  ;;  %1639 = vadd.xlane.f32.xlu1 %v1638_v32  ;;  %v4950_v47 = vand.u32 2147483648, %v4923_v62  ;;  %v4951_v14 = vand.u32 2147483648, %v4926_v54  ;;  %vm498_vm2 = vcmp.eq.f32.partialorder %v4939_v5, inf  ;;  %v2065_v13 = vpop.eup %2064 }
 0x286   :  { %v4952_v56 = vand.u32 2147483648, %v4929_v23  ;;  %v4953_v62 = vand.u32 2147483648, %v4930_v9  ;;  %2076 = vrsqrt.f32 %v2888_v27  ;;  %v3582_v23 = vsel %vm486_vm15, %v487_v8, %v485_v49 }
 0x287   :  { %v3549_v7 = vsel %vm465_vm8, %v4950_v47, %v464_v63  ;;  %v3555_v2 = vsel %vm458_vm9, %v4951_v14, %v457_v10  ;;  %v3572_v54 = vpop.xlane.xlu1 %1131  ;;  %v1199_v10 = vsel %vm189_vm0, %v3025_v1, 0.0  ;;  %v3578_v47 = vsel %vm493_vm14, %v494_v58, %v492_v22 }
 0x288   :  { %v3563_v32 = vsel %vm479_vm11, %v4952_v56, %v478_v30  ;;  %v3569_v63 = vsel %vm472_vm12, %v4953_v62, %v471_v57  ;;  %v781_v30 = vmul.f32 %v2061_v18, %v2878_v37  ;;  %v1641_v9 = vsel %vm189_vm0, %v3193_v24, 0.0  ;;  %v3587_v57 = vpop.permute.xlu0 %1526  ;;  %1200 = vadd.xlane.f32.xlu0 %v1199_v10 }
 0x289   :  { %v3592_v1 = vsel %vm505_vm1, %v4938_v6, %v504_v43  ;;  %v3595_v4 = vsel %vm498_vm2, %v4939_v5, %v497_v15  ;;  %vm775_vm3 = vcmp.eq.f32.partialorder %v2882_v50, inf  ;;  %v778_v55 = vand.u32 2147483648, %v2882_v50  ;;  %1642 = vadd.xlane.f32.xlu1 %v1641_v9 }
 0x28a   :  { %v774_v58 = vmul.f32 %v2063_v12, %v2882_v50  ;;  %vm777_vm4 = vcmp.eq.f32.partialorder %v2882_v50, 0.0  ;;  %vm768_vm5 = vcmp.eq.f32.partialorder %v2872_v31, inf  ;;  %vm782_vm6 = vcmp.eq.f32.partialorder %v2878_v37, inf  ;;  %v2067_v22 = vpop.eup %2066 }
 0x28b   :  { %v1229_v8 = vmul.f32 %v2065_v13, %v3408_v51  ;;  %vm784_vm7 = vcmp.eq.f32.partialorder %v2878_v37, 0.0  ;;  %v785_v15 = vand.u32 2147483648, %v2878_v37  ;;  %2078 = vrsqrt.f32 %v2892_v40  ;;  %v3610_v49 = vpop.xlane.xlu1 %1576 }
 0x28c   :  { %v1202_v18 = vsel %vm189_vm0, %v3066_v28, 0.0  ;;  %v783_v43 = vsel %vm782_vm6, %v2878_v37, %v781_v30  ;;  %vm789_vm8 = vcmp.eq.f32.partialorder %v2886_v35, inf  ;;  %v1644_v12 = vsel %vm189_vm0, %v1523_v59, 0.0  ;;  %v3616_v14 = vpop.xlane.xlu0 %1122  ;;  %v2069_v13 = vpop.eup %2068 }
 0x28d   :  { %2080 = vrsqrt.f32 %v3610_v49  ;;  %1203 = vadd.xlane.f32.xlu0 %v1202_v18  ;;  %vm770_vm9 = vcmp.eq.f32.partialorder %v2872_v31, 0.0  ;;  %v792_v56 = vand.u32 2147483648, %v2886_v35  ;;  %vm1230_vm10 = vcmp.eq.f32.partialorder %v3408_v51, inf  ;;  %1645 = vadd.xlane.f32.xlu1 %v1644_v12 }
 0x28e   :  { %2082 = vrsqrt.f32 %v3616_v14  ;;  %v776_v59 = vsel %vm775_vm3, %v2882_v50, %v774_v58  ;;  %v767_v62 = vmul.f32 %v2067_v22, %v2872_v31  ;;  %vm791_vm11 = vcmp.eq.f32.partialorder %v2886_v35, 0.0  ;;  %v2071_v30 = vpop.eup %2070 }
 0x28f   :  { %2084 = vrsqrt.f32 %v2894_v34  ;;  %v1231_v10 = vsel %vm1230_vm10, %v3408_v51, %v1229_v8  ;;  %v786_v9 = vsel %vm784_vm7, %v785_v15, %v783_v43  ;;  %v1233_v18 = vand.u32 2147483648, %v3408_v51  ;;  %v3634_v12 = vpop.xlane.xlu1 %1134 }
 0x290   :  { %2086 = vrsqrt.f32 %v2898_v46  ;;  %v1205_v58 = vsel %vm189_vm0, %v4954_v44, 0.0  ;;  %v788_v22 = vmul.f32 %v2069_v13, %v2886_v35  ;;  %vm803_vm12 = vcmp.eq.f32.partialorder %v2888_v27, inf  ;;  %v3644_v37 = vpop.xlane.xlu0 %1567 }
 0x291   :  { %v1647_v8 = vsel %vm189_vm0, %v3244_v29, 0.0  ;;  %vm1232_vm13 = vcmp.eq.f32.partialorder %v3408_v51, 0.0  ;;  %2088 = vrsqrt.f32 %v3634_v12  ;;  %1206 = vadd.xlane.f32.xlu0 %v1205_v58  ;;  %v2073_v15 = vpop.eup %2072  ;;  %vm1678_vm14 = vcmp.eq.f32.partialorder %v3529_v41, inf }
 0x292   :  { %v1234_v43 = vsel %vm1232_vm13, %v1233_v18, %v1231_v10  ;;  %v1681_v44 = vand.u32 2147483648, %v3529_v41  ;;  %2090 = vrsqrt.f32 %v3644_v37  ;;  %1648 = vadd.xlane.f32.xlu1 %v1647_v8  ;;  %v2075_v13 = vpop.eup %2074  ;;  %v992_v28 = vadd.f32 %v786_v9, %v3159_v52  ;;  %v4955_v18 = vld [vmem:[#allocation24_spill] sm:$0xff]  ;;  %v4956_v8 = vld [vmem:[#allocation50_spill] sm:$0xff] }
 0x293   :  { %v1236_v29 = vmul.f32 %v2071_v30, %v3491_v42  ;;  %v1677_v51 = vmul.f32 %v2073_v15, %v3529_v41  ;;  %vm1680_vm15 = vcmp.eq.f32.partialorder %v3529_v41, 0.0  ;;  %v779_v58 = vsel %vm777_vm4, %v778_v55, %v776_v59  ;;  %v3662_v9 = vpop.xlane.xlu1 %1137  ;;  %v2077_v30 = vpop.eup %2076 }
 0x294   :  { %v769_v10 = vsel %vm768_vm5, %v2872_v31, %v767_v62  ;;  %vm805_vm1 = vcmp.eq.f32.partialorder %v2888_v27, 0.0  ;;  %2092 = vrsqrt.f32 %v4955_v18  ;;  %v1208_v52 = vsel %vm189_vm0, %v4956_v8, 0.0  ;;  %v3672_v62 = vpop.xlane.xlu0 %1570 }
 0x295   :  { %v790_v15 = vsel %vm789_vm8, %v2886_v35, %v788_v22  ;;  %v1650_v50 = vsel %vm189_vm0, %v3587_v57, 0.0  ;;  %v1440_v55 = vadd.f32 %v1234_v43, %v992_v28  ;;  %v1679_v59 = vsel %vm1678_vm14, %v3529_v41, %v1677_v51  ;;  %1209 = vadd.xlane.f32.xlu0 %v1208_v52  ;;  %v4958_v52 = vld [vmem:[#allocation49_spill] sm:$0xff] }
 0x296   :  { %v1215_v8 = vmul.f32 %v2075_v13, %v3070_v25  ;;  %vm1237_vm2 = vcmp.eq.f32.partialorder %v3491_v42, inf  ;;  %v1682_v24 = vsel %vm1680_vm15, %v1681_v44, %v1679_v59  ;;  %2094 = vrsqrt.f32 %v3672_v62  ;;  %1651 = vadd.xlane.f32.xlu1 %v1650_v50 }
 0x297   :  { %v4957_v57 = vand.u32 2147483648, %v2872_v31  ;;  %v1238_v22 = vsel %vm1237_vm2, %v3491_v42, %v1236_v29  ;;  %v3684_v43 = vadd.f32 %v1682_v24, %v1440_v55  ;;  %2096 = vrsqrt.f32 %v3662_v9  ;;  %v3691_v51 = vpop.xlane.xlu1 %1582 }
 0x298   :  { %v793_v13 = vsel %vm791_vm11, %v792_v56, %v790_v15  ;;  %v802_v41 = vmul.f32 %v2077_v30, %v2888_v27  ;;  %v1240_v44 = vand.u32 2147483648, %v3491_v42  ;;  %v1211_v50 = vsel %vm189_vm0, %v4958_v52, 0.0  ;;  %v3695_v31 = vpop.eup %2078  ;;  %v1533_v35 = vpop.permute.xlu0 %1532 }
 0x299   :  { %v772_v28 = vsel %vm770_vm9, %v4957_v57, %v769_v10  ;;  %vm1216_vm3 = vcmp.eq.f32.partialorder %v3070_v25, inf  ;;  %v1653_v24 = vsel %vm189_vm0, %v3311_v61, 0.0  ;;  %vm1239_vm4 = vcmp.eq.f32.partialorder %v3491_v42, 0.0  ;;  %1212 = vadd.xlane.f32.xlu0 %v1211_v50 }
 0x29a   :  { %2098 = vrsqrt.f32 %v3691_v51  ;;  %v2081_v56 = vpop.eup %2080  ;;  %v1217_v29 = vsel %vm1216_vm3, %v3070_v25, %v1215_v8  ;;  %v1241_v10 = vsel %vm1239_vm4, %v1240_v44, %v1238_v22  ;;  %vm1685_vm5 = vcmp.eq.f32.partialorder %v3610_v49, inf  ;;  %1654 = vadd.xlane.f32.xlu1 %v1653_v24 }
 0x29b   :  { %v1688_v30 = vand.u32 2147483648, %v3610_v49  ;;  %v2083_v15 = vpop.eup %2082  ;;  %v1219_v55 = vand.u32 2147483648, %v3070_v25  ;;  %v993_v61 = vadd.f32 %v793_v13, %v3177_v17  ;;  %v1684_v42 = vmul.f32 %v2081_v56, %v3610_v49  ;;  %v3717_v44 = vpop.xlane.xlu1 %1140  ;;  %v4959_v56 = vld [vmem:[#allocation25_spill] sm:$0xff] }
 0x29c   :  { %vm1687_vm6 = vcmp.eq.f32.partialorder %v3610_v49, 0.0  ;;  %v3709_v59 = vpop.eup %2084  ;;  %v804_v8 = vsel %vm803_vm12, %v2888_v27, %v802_v41  ;;  %vm1218_vm7 = vcmp.eq.f32.partialorder %v3070_v25, 0.0  ;;  %v1222_v57 = vmul.f32 %v2083_v15, %v3616_v14 }
 0x29d   :  { %v1659_v22 = vsel %vm189_vm0, %v1533_v35, 0.0  ;;  %v2087_v52 = vpop.eup %2086  ;;  %v1220_v17 = vsel %vm1218_vm7, %v1219_v55, %v1217_v29  ;;  %v1656_v13 = vsel %vm189_vm0, %v3374_v53, 0.0  ;;  %v1441_v50 = vadd.f32 %v1241_v10, %v993_v61 }
 0x29e   :  { %v1686_v24 = vsel %vm1685_vm5, %v3610_v49, %v1684_v42  ;;  %1660 = vadd.xlane.f32.xlu0 %v1659_v22  ;;  %v2089_v41 = vpop.eup %2088  ;;  %2100 = vrsqrt.f32 %v4959_v56  ;;  %v990_v25 = vadd.f32 %v772_v28, %v3166_v20  ;;  %v991_v15 = vadd.f32 %v779_v58, %v3197_v39  ;;  %1657 = vadd.xlane.f32.xlu1 %v1656_v13 }
 0x29f   :  { %v1689_v35 = vsel %vm1687_vm6, %v1688_v30, %v1686_v24  ;;  %v2091_v29 = vpop.eup %2090  ;;  %vm507_vm0 = vcmp.eq.f32.partialorder %v4938_v6, 0.0  ;;  %v4960_v53 = vand.u32 2147483648, %v2888_v27  ;;  %vm1223_vm8 = vcmp.eq.f32.partialorder %v3616_v14, inf  ;;  %v3741_v30 = vpop.xlane.xlu1 %1585 }
 0x2a0   :  { %v3734_v55 = vadd.f32 %v1689_v35, %v1441_v50  ;;  %v1250_v20 = vmul.f32 %v2089_v41, %v3634_v12  ;;  %v809_v49 = vmul.f32 %v2087_v52, %v2898_v46  ;;  %v1438_v28 = vadd.f32 %v1220_v17, %v990_v25 }
 0x2a1   :  { %v807_v10 = vsel %vm805_vm1, %v4960_v53, %v804_v8  ;;  %v1224_v39 = vsel %vm1223_vm8, %v3616_v14, %v1222_v57  ;;  %v1663_v58 = vmul.f32 %v2091_v29, %v3644_v37  ;;  %v3743_v61 = vpop.eup %2092  ;;  %v1226_v27 = vand.u32 2147483648, %v3616_v14 }
 0x2a2   :  { %vm1664_vm9 = vcmp.eq.f32.partialorder %v3644_v37, inf  ;;  %v1667_v42 = vand.u32 2147483648, %v3644_v37  ;;  %2102 = vrsqrt.f32 %v3741_v30  ;;  %vm1225_vm10 = vcmp.eq.f32.partialorder %v3616_v14, 0.0 }
 0x2a3   :  { %vm1251_vm11 = vcmp.eq.f32.partialorder %v3634_v12, inf  ;;  %v1665_v8 = vsel %vm1664_vm9, %v3644_v37, %v1663_v58  ;;  %vm1666_vm12 = vcmp.eq.f32.partialorder %v3644_v37, 0.0  ;;  %v2095_v57 = vpop.eup %2094  ;;  %v1227_v22 = vsel %vm1225_vm10, %v1226_v27, %v1224_v39  ;;  %v4963_v27 = vld [vmem:[#allocation26_spill] sm:$0xff] }
 0x2a4   :  { %v995_v52 = vadd.f32 %v807_v10, %v3214_v38  ;;  %v1252_v17 = vsel %vm1251_vm11, %v3634_v12, %v1250_v20  ;;  %v1668_v13 = vsel %vm1666_vm12, %v1667_v42, %v1665_v8  ;;  %v2097_v50 = vpop.eup %2096  ;;  %vm500_vm13 = vcmp.eq.f32.partialorder %v4939_v5, 0.0 }
 0x2a5   :  { %vm1253_vm14 = vcmp.eq.f32.partialorder %v3634_v12, 0.0  ;;  %v1254_v14 = vand.u32 2147483648, %v3634_v12  ;;  %v1886_v24 = vadd.f32 %v1668_v13, %v1438_v28  ;;  %v1670_v41 = vmul.f32 %v2095_v57, %v3672_v62  ;;  %v4961_v28 = vld [vmem:[#allocation27_spill] sm:$0xff] }
 0x2a6   :  { %vm1671_vm15 = vcmp.eq.f32.partialorder %v3672_v62, inf  ;;  %vm1673_vm1 = vcmp.eq.f32.partialorder %v3672_v62, 0.0  ;;  %v1674_v37 = vand.u32 2147483648, %v3672_v62  ;;  %vm1699_vm2 = vcmp.eq.f32.partialorder %v3691_v51, inf }
 0x2a7   :  { %v2099_v38 = vpop.eup %2098  ;;  %v1439_v25 = vadd.f32 %v1227_v22, %v991_v15  ;;  %v1255_v35 = vsel %vm1253_vm14, %v1254_v14, %v1252_v17  ;;  %v1672_v29 = vsel %vm1671_vm15, %v3672_v62, %v1670_v41  ;;  %v1702_v53 = vand.u32 2147483648, %v3691_v51 }
 0x2a8   :  { %v1257_v12 = vmul.f32 %v2097_v50, %v3662_v9  ;;  %v1675_v10 = vsel %vm1673_vm1, %v1674_v37, %v1672_v29  ;;  %v1698_v20 = vmul.f32 %v2099_v38, %v3691_v51  ;;  %vm1701_vm3 = vcmp.eq.f32.partialorder %v3691_v51, 0.0  ;;  %v4965_v50 = vld [vmem:[#allocation28_spill] sm:$0xff]  ;;  %v4967_v29 = vld [vmem:[#allocation30_spill] sm:$0xff] }
 0x2a9   :  { %vm810_vm4 = vcmp.eq.f32.partialorder %v2898_v46, inf  ;;  %2104 = vrsqrt.f32 %v4961_v28  ;;  %v1887_v39 = vadd.f32 %v1675_v10, %v1439_v25  ;;  %v4962_v15 = vand.u32 2147483648, %v4938_v6  ;;  %v4964_v6 = vld [vmem:[#allocation29_spill] sm:$0xff] }
 0x2aa   :  { %v811_v58 = vsel %vm810_vm4, %v2898_v46, %v809_v49  ;;  %2106 = vrsqrt.f32 %v4963_v27  ;;  %v1443_v42 = vadd.f32 %v1255_v35, %v995_v52  ;;  %v1700_v8 = vsel %vm1699_vm2, %v3691_v51, %v1698_v20  ;;  %v4969_v10 = vld [vmem:[#allocation33_spill] sm:$0xff] }
 0x2ab   :  { %v3775_v62 = vsel %vm507_vm0, %v4962_v15, %v3592_v1  ;;  %v813_v57 = vand.u32 2147483648, %v2898_v46  ;;  %vm1258_vm5 = vcmp.eq.f32.partialorder %v3662_v9, inf  ;;  %v1918_v22 = vadd.f32 %v1887_v39, %v1886_v24  ;;  %v2101_v13 = vpop.eup %2100 }
 0x2ac   :  { %v1703_v17 = vsel %vm1701_vm3, %v1702_v53, %v1700_v8  ;;  %vm812_vm6 = vcmp.eq.f32.partialorder %v2898_v46, 0.0  ;;  %2108 = vrsqrt.f32 %v4964_v6  ;;  %v1259_v1 = vsel %vm1258_vm5, %v3662_v9, %v1257_v12 }
 0x2ad   :  { %v3787_v49 = vadd.f32 %v1703_v17, %v1443_v42  ;;  %v814_v52 = vsel %vm812_vm6, %v813_v57, %v811_v58  ;;  %2110 = vrsqrt.f32 %v4965_v50  ;;  %v1261_v51 = vand.u32 2147483648, %v3662_v9  ;;  %v4970_v58 = vld [vmem:[#allocation32_spill] sm:$0xff]  ;;  %v4971_v57 = vld [vmem:[#allocation34_spill] sm:$0xff] }
 0x2ae   :  { %v1919_v14 = vadd.f32 %v1918_v22, %v3684_v43  ;;  %vm796_vm7 = vcmp.eq.f32.partialorder %v2892_v40, inf  ;;  %v799_v24 = vand.u32 2147483648, %v2892_v40  ;;  %vm1260_vm0 = vcmp.eq.f32.partialorder %v3662_v9, 0.0 }
 0x2af   :  { %v4966_v46 = vand.u32 2147483648, %v4939_v5  ;;  %v2103_v37 = vpop.eup %2102  ;;  %vm798_vm8 = vcmp.eq.f32.partialorder %v2892_v40, 0.0  ;;  %v1262_v38 = vsel %vm1260_vm0, %v1261_v51, %v1259_v1  ;;  %vm1706_vm9 = vcmp.eq.f32.partialorder %v3741_v30, inf  ;;  %v4972_v1 = vld [vmem:[#allocation35_spill] sm:$0xff] }
 0x2b0   :  { %v1709_v43 = vand.u32 2147483648, %v3741_v30  ;;  %v3806_v25 = vadd.f32 %v1919_v14, %v3734_v55  ;;  %vm817_vm10 = vcmp.eq.f32.partialorder %v2894_v34, inf  ;;  %v996_v9 = vadd.f32 %v814_v52, %v3262_v36  ;;  %v4968_v55 = vld [vmem:[#allocation31_spill] sm:$0xff] }
 0x2b1   :  { %v3800_v41 = vsel %vm500_vm13, %v4966_v46, %v3595_v4  ;;  %v1705_v35 = vmul.f32 %v2103_v37, %v3741_v30  ;;  %vm1708_vm11 = vcmp.eq.f32.partialorder %v3741_v30, 0.0  ;;  %v795_v5 = vmul.f32 %v3695_v31, %v2892_v40 }
 0x2b2   :  { %vm819_vm12 = vcmp.eq.f32.partialorder %v2894_v34, 0.0  ;;  %v820_v4 = vand.u32 2147483648, %v2894_v34  ;;  %2112 = vrsqrt.f32 %v4967_v29  ;;  %vm831_vm13 = vcmp.eq.f32.partialorder %v4955_v18, inf }
 0x2b3   :  { %2114 = vrsqrt.f32 %v4968_v55  ;;  %v1444_v53 = vadd.f32 %v1262_v38, %v996_v9  ;;  %v1707_v36 = vsel %vm1706_vm9, %v3741_v30, %v1705_v35  ;;  %v816_v12 = vmul.f32 %v3709_v59, %v2894_v34  ;;  %v4973_v9 = vld [vmem:[#allocation37_spill] sm:$0xff] }
 0x2b4   :  { %vm833_vm14 = vcmp.eq.f32.partialorder %v4955_v18, 0.0  ;;  %2116 = vrsqrt.f32 %v4969_v10  ;;  %v1710_v31 = vsel %vm1708_vm11, %v1709_v43, %v1707_v36  ;;  %v834_v20 = vand.u32 2147483648, %v4955_v18 }
 0x2b5   :  { %vm824_vm15 = vcmp.eq.f32.partialorder %v4959_v56, inf  ;;  %vm826_vm1 = vcmp.eq.f32.partialorder %v4959_v56, 0.0  ;;  %v3827_v39 = vadd.f32 %v1710_v31, %v1444_v53  ;;  %v797_v30 = vsel %vm796_vm7, %v2892_v40, %v795_v5  ;;  %v4974_v5 = vld [vmem:[#allocation36_spill] sm:$0xff] }
 0x2b6   :  { %v823_v15 = vmul.f32 %v2101_v13, %v4959_v56  ;;  %v827_v59 = vand.u32 2147483648, %v4959_v56  ;;  %2118 = vrsqrt.f32 %v4970_v58  ;;  %v2105_v42 = vpop.eup %2104  ;;  %v830_v8 = vmul.f32 %v3743_v61, %v4955_v18 }
 0x2b7   :  { %vm845_vm2 = vcmp.eq.f32.partialorder %v4963_v27, inf  ;;  %vm847_vm3 = vcmp.eq.f32.partialorder %v4963_v27, 0.0  ;;  %2120 = vrsqrt.f32 %v4971_v57  ;;  %v2107_v22 = vpop.eup %2106  ;;  %v818_v17 = vsel %vm817_vm10, %v2894_v34, %v816_v12 }
 0x2b8   :  { %v848_v13 = vand.u32 2147483648, %v4963_v27  ;;  %vm838_vm4 = vcmp.eq.f32.partialorder %v4961_v28, inf  ;;  %2122 = vrsqrt.f32 %v4972_v1  ;;  %v800_v61 = vsel %vm798_vm8, %v799_v24, %v797_v30 }
 0x2b9   :  { %vm840_vm5 = vcmp.eq.f32.partialorder %v4961_v28, 0.0  ;;  %v841_v52 = vand.u32 2147483648, %v4961_v28  ;;  %vm859_vm6 = vcmp.eq.f32.partialorder %v4965_v50, inf  ;;  %v2109_v51 = vpop.eup %2108  ;;  %v825_v14 = vsel %vm824_vm15, %v4959_v56, %v823_v15 }
 0x2ba   :  { %v837_v46 = vmul.f32 %v2105_v42, %v4961_v28  ;;  %vm861_vm7 = vcmp.eq.f32.partialorder %v4965_v50, 0.0  ;;  %v862_v37 = vand.u32 2147483648, %v4965_v50  ;;  %vm852_vm0 = vcmp.eq.f32.partialorder %v4964_v6, inf  ;;  %v2111_v40 = vpop.eup %2110 }
 0x2bb   :  { %v821_v24 = vsel %vm819_vm12, %v820_v4, %v818_v17  ;;  %v832_v38 = vsel %vm831_vm13, %v4955_v18, %v830_v8  ;;  %v844_v43 = vmul.f32 %v2107_v22, %v4963_v27  ;;  %vm854_vm8 = vcmp.eq.f32.partialorder %v4964_v6, 0.0 }
 0x2bc   :  { %2124 = vrsqrt.f32 %v4973_v9  ;;  %v855_v35 = vand.u32 2147483648, %v4964_v6  ;;  %vm873_vm9 = vcmp.eq.f32.partialorder %v4967_v29, inf  ;;  %v3870_v53 = vadd.f32 %v800_v61, %v3224_v45 }
 0x2bd   :  { %2126 = vrsqrt.f32 %v4974_v5  ;;  %v828_v34 = vsel %vm826_vm1, %v827_v59, %v825_v14  ;;  %v851_v4 = vmul.f32 %v2109_v51, %v4964_v6  ;;  %v876_v36 = vand.u32 2147483648, %v4967_v29  ;;  %v4977_v14 = vld [vmem:[#allocation39_spill] sm:$0xff] }
 0x2be   :  { %v869_v12 = vand.u32 2147483648, %v4968_v55  ;;  %v835_v31 = vsel %vm833_vm14, %v834_v20, %v832_v38  ;;  %v839_v30 = vsel %vm838_vm4, %v4961_v28, %v837_v46  ;;  %v858_v15 = vmul.f32 %v2111_v40, %v4965_v50  ;;  %v4975_v20 = vld [vmem:[#allocation38_spill] sm:$0xff]  ;;  %v4978_v46 = vld [vmem:[#allocation11_spill] sm:$0xff] }
 0x2bf   :  { %vm875_vm10 = vcmp.eq.f32.partialorder %v4967_v29, 0.0  ;;  %vm866_vm11 = vcmp.eq.f32.partialorder %v4968_v55, inf  ;;  %v3886_v45 = vadd.f32 %v821_v24, %v3252_v16  ;;  %v2113_v56 = vpop.eup %2112  ;;  %v846_v59 = vsel %vm845_vm2, %v4963_v27, %v844_v43  ;;  %v4976_v16 = vld [vmem:[#allocation12_spill] sm:$0xff] }
 0x2c0   :  { %vm887_vm12 = vcmp.eq.f32.partialorder %v4970_v58, inf  ;;  %v890_v18 = vand.u32 2147483648, %v4970_v58  ;;  %2128 = vrsqrt.f32 %v4975_v20  ;;  %v2115_v42 = vpop.eup %2114  ;;  %vm880_vm13 = vcmp.eq.f32.partialorder %v4969_v10, inf }
 0x2c1   :  { %v883_v8 = vand.u32 2147483648, %v4969_v10  ;;  %2130 = vrsqrt.f32 %v3717_v44  ;;  %v3898_v22 = vadd.f32 %v828_v34, %v4976_v16  ;;  %v2117_v17 = vpop.eup %2116  ;;  %v842_v61 = vsel %vm840_vm5, %v841_v52, %v839_v30  ;;  %v4979_v30 = vld [vmem:[#allocation14_spill] sm:$0xff]  ;;  %v3935_v16 = vpop.xlane.xlu1 %1143 }
 0x2c2   :  { %v853_v51 = vsel %vm852_vm0, %v4964_v6, %v851_v4  ;;  %vm868_vm14 = vcmp.eq.f32.partialorder %v4968_v55, 0.0  ;;  %2132 = vrsqrt.f32 %v4977_v14  ;;  %v3908_v40 = vadd.f32 %v835_v31, %v4978_v46  ;;  %v4980_v6 = vld [vmem:[#allocation13_spill] sm:$0xff] }
 0x2c3   :  { %v849_v24 = vsel %vm847_vm3, %v848_v13, %v846_v59  ;;  %v860_v38 = vsel %vm859_vm6, %v4965_v50, %v858_v15  ;;  %v872_v28 = vmul.f32 %v2113_v56, %v4967_v29  ;;  %vm889_vm15 = vcmp.eq.f32.partialorder %v4970_v58, 0.0  ;;  %v2119_v52 = vpop.eup %2118  ;;  %v4981_v50 = vld [vmem:[#allocation40_spill] sm:$0xff]  ;;  %v4982_v46 = vld [vmem:[#allocation41_spill] sm:$0xff] }
 0x2c4   :  { %vm882_vm1 = vcmp.eq.f32.partialorder %v4969_v10, 0.0  ;;  %2134 = vrsqrt.f32 %v3572_v54  ;;  %v865_v43 = vmul.f32 %v2115_v42, %v4968_v55  ;;  %vm901_vm2 = vcmp.eq.f32.partialorder %v4971_v57, inf  ;;  %v2121_v13 = vpop.eup %2120 }
 0x2c5   :  { %v904_v27 = vand.u32 2147483648, %v4971_v57  ;;  %vm894_vm3 = vcmp.eq.f32.partialorder %v4972_v1, inf  ;;  %v856_v34 = vsel %vm854_vm8, %v855_v35, %v853_v51  ;;  %v879_v4 = vmul.f32 %v2117_v17, %v4969_v10  ;;  %v2123_v56 = vpop.eup %2122 }
 0x2c6   :  { %vm903_vm4 = vcmp.eq.f32.partialorder %v4971_v57, 0.0  ;;  %v3929_v15 = vadd.f32 %v842_v61, %v4979_v30  ;;  %v863_v59 = vsel %vm861_vm7, %v862_v37, %v860_v38  ;;  %vm915_vm5 = vcmp.eq.f32.partialorder %v4974_v5, inf }
 0x2c7   :  { %v3938_v35 = vadd.f32 %v849_v24, %v4980_v6  ;;  %v874_v17 = vsel %vm873_vm9, %v4967_v29, %v872_v28  ;;  %v886_v61 = vmul.f32 %v2119_v52, %v4970_v58  ;;  %vm896_vm6 = vcmp.eq.f32.partialorder %v4972_v1, 0.0 }
 0x2c8   :  { %vm908_vm0 = vcmp.eq.f32.partialorder %v4973_v9, inf  ;;  %2136 = vrsqrt.f32 %v4981_v50  ;;  %v867_v37 = vsel %vm866_vm11, %v4968_v55, %v865_v43  ;;  %v3953_v24 = vadd.f32 %v856_v34, %v3356_v33  ;;  %v4983_v43 = vld [vmem:[#allocation42_spill] sm:$0xff] }
 0x2c9   :  { %2138 = vrsqrt.f32 %v4982_v46  ;;  %v2125_v38 = vpop.eup %2124  ;;  %v881_v28 = vsel %vm880_vm13, %v4969_v10, %v879_v4  ;;  %v900_v52 = vmul.f32 %v2121_v13, %v4971_v57  ;;  %v893_v30 = vmul.f32 %v2123_v56, %v4972_v1 }
 0x2ca   :  { %vm917_vm7 = vcmp.eq.f32.partialorder %v4974_v5, 0.0  ;;  %2140 = vrsqrt.f32 %v4983_v43 }
 0x2cb   :  { %2283 = shalt.err (!%p2280_p9)
}
 0x2cc   :  { %1968 = dma.vmem_to_hbm [thread:$0]  %s1963_s6, 4096, %s4834_s2, [#allocation4], %s2319_s15, %s2319_s15, %s2320_s16   ;;  %v2127_v33 = vpop.eup %2126  ;;  %v877_v13 = vsel %vm875_vm10, %v876_v36, %v874_v17  ;;  %vm910_vm8 = vcmp.eq.f32.partialorder %v4973_v9, 0.0  ;;  %vm929_vm9 = vcmp.eq.f32.partialorder %v4975_v20, inf  ;;  %2142 = vrsqrt.f32 %v3935_v16  ;;  %v3975_v34 = vpop.xlane.xlu1 %1588  ;;  %v4984_v4 = vld [vmem:[#allocation15_spill] sm:$0xff]  ;;  %v4986_v10 = vld [vmem:[#allocation44_spill] sm:$0xff] }
 0x2cd   :  { %v3978_v56 = vadd.f32 %v863_v59, %v4984_v4  ;;  %v870_v6 = vsel %vm868_vm14, %v869_v12, %v867_v37  ;;  %v888_v29 = vsel %vm887_vm12, %v4970_v58, %v886_v61  ;;  %2144 = vrsqrt.f32 %v3975_v34  ;;  %v4985_v42 = vld [vmem:[#allocation43_spill] sm:$0xff]  ;;  %v2129_v55 = vpop.eup %2128  ;;  %s2325_s2 = smov [#allocation6]  }
 0x2ce   :  { %v884_v17 = vsel %vm882_vm1, %v883_v8, %v881_v28  ;;  %v907_v59 = vmul.f32 %v2125_v38, %v4973_v9  ;;  %2146 = vrsqrt.f32 %v4985_v42  ;;  %v902_v12 = vsel %vm901_vm2, %v4971_v57, %v900_v52  ;;  %v4006_v8 = vpop.xlane.xlu0 %1579  ;;  %v2131_v38 = vpop.eup %2130  ;;  %s1975_s15 = sshll.u32 %s2325_s2, 4  ;;  %s1976_s15 = int_to_ptr.vmem [resolvable:$true] %s1975_s15 }
 0x2cf   :  { %v895_v61 = vsel %vm894_vm3, %v4972_v1, %v893_v30  ;;  %v914_v37 = vmul.f32 %v2127_v33, %v4974_v5  ;;  %vm931_vm10 = vcmp.eq.f32.partialorder %v4975_v20, 0.0  ;;  %vm922_vm11 = vcmp.eq.f32.partialorder %v4977_v14, inf  ;;  %v4987_v33 = vld [vmem:[#allocation16_spill] sm:$0xff]  ;;  %v2133_v36 = vpop.eup %2132  ;;  %s2292_s16 = scalar_lea.vmem %s1976_s15, 16  ;;  %s2296_s10 = scalar_lea.vmem %s1976_s15, 32 }
 0x2d0   :  { %2148 = vrsqrt.f32 %v4986_v10  ;;  %v891_v28 = vsel %vm889_vm15, %v890_v18, %v888_v29  ;;  %v4013_v52 = vpop.xlane.xlu1 %1146  ;;  %v4016_v30 = vadd.f32 %v870_v6, %v3395_v11  ;;  %v4019_v4 = vadd.f32 %v877_v13, %v4987_v33  ;;  %v4990_v33 = vld [vmem:[#allocation45_spill] sm:$0xff]  ;;  %p2293_p10 = scmp.ne.s32.totalorder %s1976_s15, %s2292_s16  ;;  %p2297_p11 = scmp.lt.s32.totalorder %s1976_s15, %s1976_s15 }
 0x2d1   :  { %2150 = vrsqrt.f32 %v4006_v8  ;;  %v4025_v58 = vadd.f32 %v884_v17, %v3416_v0  ;;  %v2135_v18 = vpop.eup %2134  ;;  %v905_v11 = vsel %vm903_vm4, %v904_v27, %v902_v12  ;;  %v4989_v6 = vand.u32 2147483648, %v4972_v1  ;;  %v4991_v27 = vld [vmem:[#allocation46_spill] sm:$0xff]  ;;  %p2298_p12 = scmp.lt.s32.totalorder %s2296_s10, %s2292_s16 }
 0x2d2   :  { %2152 = vrsqrt.f32 %v4013_v52  ;;  %v909_v29 = vsel %vm908_vm0, %v4973_v9, %v907_v59  ;;  %vm924_vm12 = vcmp.eq.f32.partialorder %v4977_v14, 0.0  ;;  %v916_v0 = vsel %vm915_vm5, %v4974_v5, %v914_v37  ;;  %v4046_v1 = vpop.xlane.xlu0 %1149 }
 0x2d3   :  { %4988 = vst [vmem:[#allocation18_spill] sm:$0xff] %v4025_v58  ;;  %v898_v13 = vsel %vm896_vm6, %v4989_v6, %v895_v61  ;;  %2154 = vrsqrt.f32 %v4990_v33  ;;  %v928_v57 = vmul.f32 %v2129_v55, %v4975_v20  ;;  %v1264_v17 = vmul.f32 %v2131_v38, %v3717_v44  ;;  %p2299_p13 = por %p2298_p12, %p2297_p11 }
 0x2d4   :  { %2156 = vrsqrt.f32 %v4991_v27  ;;  %v921_v12 = vmul.f32 %v2133_v36, %v4977_v14  ;;  %v4051_v6 = vpop.xlane.xlu1 %1591  ;;  %v4054_v31 = vadd.f32 %v891_v28, %v3404_v21  ;;  %v4993_v37 = vand.u32 2147483648, %v4973_v9  ;;  %v4996_v28 = vld [vmem:[#allocation17_spill] sm:$0xff] }
 0x2d5   :  { %v1243_v38 = vmul.f32 %v2135_v18, %v3572_v54  ;;  %2158 = vrsqrt.f32 %v4051_v6  ;;  %v4063_v36 = vadd.f32 %v898_v13, %v3456_v19  ;;  %v2137_v59 = vpop.eup %2136  ;;  %v4995_v61 = vand.u32 2147483648, %v4974_v5  ;;  %v4998_v13 = vld [vmem:[#allocation47_spill] sm:$0xff]  ;;  %p2300_p0 = pnand %p2299_p13, %p2293_p10 }
 0x2d6   :  { %4992 = vst [vmem:[#allocation19_spill] sm:$0xff] %v4054_v31  ;;  %v912_v55 = vsel %vm910_vm8, %v4993_v37, %v909_v29  ;;  %vm1265_vm13 = vcmp.eq.f32.partialorder %v3717_v44, inf  ;;  %v4072_v9 = vadd.f32 %v905_v11, %v4996_v28  ;;  %v2139_v29 = vpop.eup %2138  ;;  %v930_v18 = vsel %vm929_vm9, %v4975_v20, %v928_v57  ;;  %v4080_v5 = vpop.xlane.xlu0 %1152 }
 0x2d7   :  { %4994 = vst [vmem:[#allocation20_spill] sm:$0xff] %v4063_v36  ;;  %v919_v51 = vsel %vm917_vm7, %v4995_v61, %v916_v0  ;;  %2160 = vrsqrt.f32 %v4998_v13  ;;  %v1266_v37 = vsel %vm1265_vm13, %v3717_v44, %v1264_v17  ;;  %v2141_v0 = vpop.eup %2140  ;;  %v923_v61 = vsel %vm922_vm11, %v4977_v14, %v921_v12 }
 0x2d8   :  { %4997 = vst [vmem:[#allocation21_spill] sm:$0xff] %v4072_v9  ;;  %vm1244_vm14 = vcmp.eq.f32.partialorder %v3572_v54, inf  ;;  %v1268_v11 = vand.u32 2147483648, %v3717_v44  ;;  %v4087_v28 = vpop.xlane.xlu1 %1594  ;;  %v4090_v57 = vadd.f32 %v912_v55, %v3471_v26  ;;  %vm1267_vm15 = vcmp.eq.f32.partialorder %v3717_v44, 0.0 }
 0x2d9   :  { %v2143_v19 = vpop.eup %2142  ;;  %v1245_v21 = vsel %vm1244_vm14, %v3572_v54, %v1243_v38  ;;  %2162 = vrsqrt.f32 %v4087_v28  ;;  %v4096_v17 = vadd.f32 %v919_v51, %v3465_v3  ;;  %v5001_v9 = vand.u32 2147483648, %v4975_v20 }
 0x2da   :  { %4999 = vst [vmem:[#allocation22_spill] sm:$0xff] %v4090_v57  ;;  %v2145_v12 = vpop.eup %2144  ;;  %v1247_v55 = vand.u32 2147483648, %v3572_v54  ;;  %v1269_v57 = vsel %vm1267_vm15, %v1268_v11, %v1266_v37  ;;  %v5002_v44 = vand.u32 2147483648, %v4977_v14  ;;  %v4113_v3 = vmul.f32 %v2137_v59, %v4981_v50  ;;  %v4117_v51 = vpop.xlane.xlu0 %1155 }
 0x2db   :  { %5000 = vst [vmem:[#allocation23_spill] sm:$0xff] %v4096_v17  ;;  %v4102_v36 = vsel %vm931_vm10, %v5001_v9, %v930_v18  ;;  %v2147_v38 = vpop.eup %2146  ;;  %vm1246_vm1 = vcmp.eq.f32.partialorder %v3572_v54, 0.0  ;;  %v1712_v20 = vmul.f32 %v2145_v12, %v3975_v34  ;;  %v4120_v18 = vmul.f32 %v2139_v29, %v4982_v46 }
 0x2dc   :  { %v4110_v31 = vsel %vm924_vm12, %v5002_v44, %v923_v61  ;;  %v1248_v37 = vsel %vm1246_vm1, %v1247_v55, %v1245_v21  ;;  %vm1713_vm2 = vcmp.eq.f32.partialorder %v3975_v34, inf  ;;  %v1716_v14 = vand.u32 2147483648, %v3975_v34  ;;  %v4124_v61 = vpop.xlane.xlu1 %1597 }
 0x2dd   :  { %v2149_v9 = vpop.eup %2148  ;;  %v1445_v59 = vadd.f32 %v1269_v57, %v3886_v45  ;;  %v1271_v54 = vmul.f32 %v2143_v19, %v3935_v16  ;;  %v1714_v12 = vsel %vm1713_vm2, %v3975_v34, %v1712_v20  ;;  %vm1715_vm3 = vcmp.eq.f32.partialorder %v3975_v34, 0.0 }
 0x2de   :  { %v2151_v11 = vpop.eup %2150  ;;  %v4131_v29 = vmul.f32 %v2141_v0, %v4983_v43  ;;  %v4134_v21 = vmul.f32 %v2147_v38, %v4985_v42  ;;  %v1717_v55 = vsel %vm1715_vm3, %v1716_v14, %v1714_v12  ;;  %vm1692_vm4 = vcmp.eq.f32.partialorder %v4006_v8, inf  ;;  %v4142_v34 = vpop.xlane.xlu0 %1158 }
 0x2df   :  { %v2153_v44 = vpop.eup %2152  ;;  %v1691_v26 = vmul.f32 %v2151_v11, %v4006_v8  ;;  %v4137_v58 = vadd.f32 %v1717_v55, %v1445_v59  ;;  %v1695_v45 = vand.u32 2147483648, %v4006_v8  ;;  %vm943_vm5 = vcmp.eq.f32.partialorder %v4981_v50, inf }
 0x2e0   :  { %v2155_v17 = vpop.eup %2154  ;;  %v1278_v19 = vmul.f32 %v2153_v44, %v4013_v52  ;;  %v1442_v0 = vadd.f32 %v1248_v37, %v3870_v53  ;;  %vm1272_vm6 = vcmp.eq.f32.partialorder %v3935_v16, inf  ;;  %vm1694_vm0 = vcmp.eq.f32.partialorder %v4006_v8, 0.0  ;;  %v4149_v20 = vpop.xlane.xlu1 %1600 }
 0x2e1   :  { %v2157_v57 = vpop.eup %2156  ;;  %v1693_v38 = vsel %vm1692_vm4, %v4006_v8, %v1691_v26  ;;  %vm957_vm7 = vcmp.eq.f32.partialorder %v4983_v43, inf  ;;  %v4153_v14 = vmul.f32 %v2149_v9, %v4986_v10  ;;  %vm971_vm8 = vcmp.eq.f32.partialorder %v4986_v10, inf }
 0x2e2   :  { %v1273_v11 = vsel %vm1272_vm6, %v3935_v16, %v1271_v54  ;;  %v1696_v59 = vsel %vm1694_vm0, %v1695_v45, %v1693_v38  ;;  %2164 = vrsqrt.f32 %v4046_v1  ;;  %v2159_v53 = vpop.eup %2158  ;;  %vm936_vm9 = vcmp.eq.f32.partialorder %v4982_v46, inf  ;;  %v4171_v12 = vpop.xlane.xlu0 %1161 }
 0x2e3   :  { %v4160_v26 = vmul.f32 %v2155_v17, %v4990_v33  ;;  %vm985_vm10 = vcmp.eq.f32.partialorder %v4991_v27, inf  ;;  %v1275_v8 = vand.u32 2147483648, %v3935_v16  ;;  %v1890_v37 = vadd.f32 %v1696_v59, %v1442_v0 }
 0x2e4   :  { %vm1279_vm11 = vcmp.eq.f32.partialorder %v4013_v52, inf  ;;  %vm945_vm12 = vcmp.eq.f32.partialorder %v4981_v50, 0.0  ;;  %vm950_vm13 = vcmp.eq.f32.partialorder %v4985_v42, inf  ;;  %v984_v9 = vmul.f32 %v2157_v57, %v4991_v27  ;;  %v2161_v44 = vpop.eup %2160 }
 0x2e5   :  { %vm1274_vm14 = vcmp.eq.f32.partialorder %v3935_v16, 0.0  ;;  %v1280_v54 = vsel %vm1279_vm11, %v4013_v52, %v1278_v19  ;;  %v1719_v17 = vmul.f32 %v2159_v53, %v4051_v6  ;;  %vm959_vm15 = vcmp.eq.f32.partialorder %v4983_v43, 0.0  ;;  %v4180_v19 = vpop.xlane.xlu1 %1603 }
 0x2e6   :  { %vm964_vm2 = vcmp.eq.f32.partialorder %v4990_v33, inf  ;;  %vm978_vm3 = vcmp.eq.f32.partialorder %v4998_v13, inf  ;;  %v1276_v55 = vsel %vm1274_vm14, %v1275_v8, %v1273_v11  ;;  %v1921_v45 = vadd.f32 %v3806_v25, %v1890_v37  ;;  %v2163_v38 = vpop.eup %2162  ;;  %v4197_v37 = vpop.xlane.xlu0 %1164 }
 0x2e7   :  { %v1282_v16 = vand.u32 2147483648, %v4013_v52  ;;  %vm1720_vm4 = vcmp.eq.f32.partialorder %v4051_v6, inf  ;;  %vm938_vm6 = vcmp.eq.f32.partialorder %v4982_v46, 0.0  ;;  %vm1281_vm11 = vcmp.eq.f32.partialorder %v4013_v52, 0.0 }
 0x2e8   :  { %v1721_v57 = vsel %vm1720_vm4, %v4051_v6, %v1719_v17  ;;  %v1723_v0 = vand.u32 2147483648, %v4051_v6  ;;  %2166 = vrsqrt.f32 %v4080_v5  ;;  %vm952_vm14 = vcmp.eq.f32.partialorder %v4985_v42, 0.0 }
 0x2e9   :  { %v1922_v25 = vadd.f32 %v1921_v45, %v3787_v49  ;;  %v1283_v11 = vsel %vm1281_vm11, %v1282_v16, %v1280_v54  ;;  %vm1722_vm1 = vcmp.eq.f32.partialorder %v4051_v6, 0.0  ;;  %2168 = vrsqrt.f32 %v4124_v61  ;;  %v4203_v54 = vpop.xlane.xlu1 %1606 }
 0x2ea   :  { %vm966_vm0 = vcmp.eq.f32.partialorder %v4990_v33, 0.0  ;;  %v977_v52 = vmul.f32 %v2161_v44, %v4998_v13  ;;  %vm980_vm4 = vcmp.eq.f32.partialorder %v4998_v13, 0.0  ;;  %v1446_v59 = vadd.f32 %v1276_v55, %v3898_v22 }
 0x2eb   :  { %v1724_v53 = vsel %vm1722_vm1, %v1723_v0, %v1721_v57  ;;  %v1726_v8 = vmul.f32 %v2163_v38, %v4087_v28  ;;  %v1923_v49 = vadd.f32 %v1922_v25, %v3827_v39  ;;  %vm1727_vm11 = vcmp.eq.f32.partialorder %v4087_v28, inf  ;;  %v4220_v57 = vpop.xlane.xlu0 %1167 }
 0x2ec   :  { %v1730_v6 = vand.u32 2147483648, %v4087_v28  ;;  %2170 = vrsqrt.f32 %v4117_v51  ;;  %v1447_v17 = vadd.f32 %v1283_v11, %v3908_v40  ;;  %vm1729_vm1 = vcmp.eq.f32.partialorder %v4087_v28, 0.0 }
 0x2ed   :  { %v1728_v44 = vsel %vm1727_vm11, %v4087_v28, %v1726_v8  ;;  %2172 = vrsqrt.f32 %v4149_v20  ;;  %v1894_v22 = vadd.f32 %v1724_v53, %v1446_v59  ;;  %v1924_v55 = vadd.f32 %v1923_v49, %v4137_v58  ;;  %v4234_v38 = vpop.xlane.xlu1 %1609 }
 0x2ee   :  { %v1731_v39 = vsel %vm1729_vm1, %v1730_v6, %v1728_v44  ;;  %2174 = vrsqrt.f32 %v4142_v34  ;;  %v944_v45 = vsel %vm943_vm5, %v4981_v50, %v4113_v3  ;;  %v937_v40 = vsel %vm936_vm9, %v4982_v46, %v4120_v18 }
 0x2ef   :  { %v981_v28 = vand.u32 2147483648, %v4998_v13  ;;  %v1895_v16 = vadd.f32 %v1731_v39, %v1447_v17  ;;  %v958_v58 = vsel %vm957_vm7, %v4983_v43, %v4131_v29  ;;  %v951_v3 = vsel %vm950_vm13, %v4985_v42, %v4134_v21  ;;  %v2165_v11 = vpop.eup %2164  ;;  %v4270_v17 = vpop.xlane.xlu0 %1170 }
 0x2f0   :  { %v972_v18 = vsel %vm971_vm8, %v4986_v10, %v4153_v14  ;;  %v1925_v0 = vadd.f32 %v1924_v55, %v1894_v22  ;;  %v965_v25 = vsel %vm964_vm2, %v4990_v33, %v4160_v26  ;;  %v986_v29 = vsel %vm985_vm10, %v4991_v27, %v984_v9 }
 0x2f1   :  { %v979_v21 = vsel %vm978_vm3, %v4998_v13, %v977_v52  ;;  %2176 = vrsqrt.f32 %v4171_v12  ;;  %v5003_v14 = vand.u32 2147483648, %v4981_v50  ;;  %v5004_v53 = vand.u32 2147483648, %v4982_v46  ;;  %v4280_v55 = vpop.xlane.xlu1 %1612 }
 0x2f2   :  { %v4255_v8 = vadd.f32 %v1925_v0, %v1895_v16  ;;  %2178 = vrsqrt.f32 %v4180_v19  ;;  %v5005_v9 = vand.u32 2147483648, %v4983_v43  ;;  %v5006_v49 = vand.u32 2147483648, %v4985_v42 }
 0x2f3   :  { %v947_v59 = vsel %vm945_vm12, %v5003_v14, %v944_v45  ;;  %v940_v26 = vsel %vm938_vm6, %v5004_v53, %v937_v40  ;;  %v5007_v6 = vand.u32 2147483648, %v4986_v10  ;;  %vm5008_vm5 = vcmp.eq.f32.partialorder %v4986_v10, 0.0 }
 0x2f4   :  { %v961_v52 = vsel %vm959_vm15, %v5005_v9, %v958_v58  ;;  %v954_v50 = vsel %vm952_vm14, %v5006_v49, %v951_v3  ;;  %v4274_v44 = vadd.f32 %v4110_v31, %v3514_v60  ;;  %v5009_v22 = vand.u32 2147483648, %v4990_v33 }
 0x2f5   :  { %v975_v46 = vsel %vm5008_vm5, %v5007_v6, %v972_v18  ;;  %v4284_v42 = vadd.f32 %v4102_v36, %v3508_v48  ;;  %v5010_v10 = vand.u32 2147483648, %v4991_v27  ;;  %vm5011_vm7 = vcmp.eq.f32.partialorder %v4991_v27, 0.0  ;;  %v2167_v48 = vpop.eup %2166 }
 0x2f6   :  { %v968_v43 = vsel %vm966_vm0, %v5009_v22, %v965_v25  ;;  %v982_v60 = vsel %vm980_vm4, %v981_v28, %v979_v21  ;;  %v1285_v31 = vmul.f32 %v2165_v11, %v4046_v1  ;;  %2180 = vrsqrt.f32 %v4197_v37  ;;  %v2169_v40 = vpop.eup %2168 }
 0x2f7   :  { %v989_v39 = vsel %vm5011_vm7, %v5010_v10, %v986_v29  ;;  %v4295_v33 = vadd.f32 %v940_v26, %v3555_v2  ;;  %v4298_v45 = vadd.f32 %v947_v59, %v3549_v7  ;;  %2182 = vrsqrt.f32 %v4203_v54  ;;  %v4311_v2 = vpop.xlane.xlu0 %1173 }
 0x2f8   :  { %v4302_v36 = vadd.f32 %v954_v50, %v3569_v63  ;;  %v4305_v27 = vadd.f32 %v961_v52, %v3563_v32  ;;  %v4308_v13 = vadd.f32 %v975_v46, %v3578_v47  ;;  %vm1286_vm8 = vcmp.eq.f32.partialorder %v4046_v1, inf  ;;  %v4326_v47 = vpop.xlane.xlu1 %1615 }
 0x2f9   :  { %v4314_v7 = vadd.f32 %v968_v43, %v3582_v23  ;;  %v4317_v28 = vadd.f32 %v989_v39, %v3775_v62  ;;  %v4320_v63 = vadd.f32 %v982_v60, %v3800_v41  ;;  %vm1288_vm9 = vcmp.eq.f32.partialorder %v4046_v1, 0.0  ;;  %v2171_v16 = vpop.eup %2170 }
 0x2fa   :  { %v1289_v32 = vand.u32 2147483648, %v4046_v1  ;;  %vm1293_vm10 = vcmp.eq.f32.partialorder %v4080_v5, inf  ;;  %vm1295_vm12 = vcmp.eq.f32.partialorder %v4080_v5, 0.0  ;;  %v1287_v23 = vsel %vm1286_vm8, %v4046_v1, %v1285_v31  ;;  %v2173_v41 = vpop.eup %2172 }
 0x2fb   :  { %v1292_v58 = vmul.f32 %v2167_v48, %v4080_v5  ;;  %v1296_v62 = vand.u32 2147483648, %v4080_v5  ;;  %vm1300_vm13 = vcmp.eq.f32.partialorder %v4117_v51, inf  ;;  %v1303_v3 = vand.u32 2147483648, %v4117_v51  ;;  %v2175_v0 = vpop.eup %2174  ;;  %v4341_v29 = vpop.xlane.xlu0 %1176 }
 0x2fc   :  { %v1733_v18 = vmul.f32 %v2169_v40, %v4124_v61  ;;  %vm1734_vm15 = vcmp.eq.f32.partialorder %v4124_v61, inf  ;;  %2184 = vrsqrt.f32 %v4220_v57  ;;  %vm1302_vm2 = vcmp.eq.f32.partialorder %v4117_v51, 0.0  ;;  %v4348_v14 = vpop.xlane.xlu1 %1618 }
 0x2fd   :  { %vm1736_vm3 = vcmp.eq.f32.partialorder %v4124_v61, 0.0  ;;  %v1737_v25 = vand.u32 2147483648, %v4124_v61  ;;  %vm1307_vm6 = vcmp.eq.f32.partialorder %v4142_v34, inf  ;;  %2186 = vrsqrt.f32 %v4234_v38 }
 0x2fe   :  { %v1290_v21 = vsel %vm1288_vm9, %v1289_v32, %v1287_v23  ;;  %vm1309_vm0 = vcmp.eq.f32.partialorder %v4142_v34, 0.0  ;;  %v1310_v11 = vand.u32 2147483648, %v4142_v34  ;;  %vm1741_vm14 = vcmp.eq.f32.partialorder %v4149_v20, inf  ;;  %v2177_v1 = vpop.eup %2176 }
 0x2ff   :  { %v1294_v59 = vsel %vm1293_vm10, %v4080_v5, %v1292_v58  ;;  %v1299_v53 = vmul.f32 %v2171_v16, %v4117_v51  ;;  %v1740_v26 = vmul.f32 %v2173_v41, %v4149_v20  ;;  %vm1743_vm4 = vcmp.eq.f32.partialorder %v4149_v20, 0.0  ;;  %v2179_v50 = vpop.eup %2178  ;;  %v4366_v22 = vpop.xlane.xlu0 %1179 }
 0x300   :  { %v1735_v9 = vsel %vm1734_vm15, %v4124_v61, %v1733_v18  ;;  %v1306_v52 = vmul.f32 %v2175_v0, %v4142_v34  ;;  %v1744_v49 = vand.u32 2147483648, %v4149_v20  ;;  %2188 = vrsqrt.f32 %v4270_v17 }
 0x301   :  { %v1448_v6 = vadd.f32 %v1290_v21, %v3929_v15  ;;  %vm1314_vm11 = vcmp.eq.f32.partialorder %v4171_v12, inf  ;;  %v1317_v46 = vand.u32 2147483648, %v4171_v12  ;;  %2190 = vrsqrt.f32 %v4280_v55  ;;  %v4374_v15 = vpop.xlane.xlu1 %1621 }
 0x302   :  { %v1297_v43 = vsel %vm1295_vm12, %v1296_v62, %v1294_v59  ;;  %vm1316_vm1 = vcmp.eq.f32.partialorder %v4171_v12, 0.0  ;;  %vm1748_vm5 = vcmp.eq.f32.partialorder %v4180_v19, inf  ;;  %vm1750_vm7 = vcmp.eq.f32.partialorder %v4180_v19, 0.0 }
 0x303   :  { %v1751_v10 = vand.u32 2147483648, %v4180_v19  ;;  %v1301_v39 = vsel %vm1300_vm13, %v4117_v51, %v1299_v53  ;;  %v1738_v60 = vsel %vm1736_vm3, %v1737_v25, %v1735_v9  ;;  %v1742_v5 = vsel %vm1741_vm14, %v4149_v20, %v1740_v26  ;;  %v2181_v31 = vpop.eup %2180  ;;  %v4395_v58 = vpop.xlane.xlu0 %1182 }
 0x304   :  { %2192 = vrsqrt.f32 %v4326_v47  ;;  %v1308_v48 = vsel %vm1307_vm6, %v4142_v34, %v1306_v52  ;;  %v1313_v40 = vmul.f32 %v2177_v1, %v4171_v12  ;;  %v1747_v32 = vmul.f32 %v2179_v50, %v4180_v19  ;;  %v2183_v16 = vpop.eup %2182 }
 0x305   :  { %vm1321_vm8 = vcmp.eq.f32.partialorder %v4197_v37, inf  ;;  %v1449_v61 = vadd.f32 %v1297_v43, %v3938_v35  ;;  %v1324_v23 = vand.u32 2147483648, %v4197_v37  ;;  %vm1755_vm9 = vcmp.eq.f32.partialorder %v4203_v54, inf  ;;  %v4403_v35 = vpop.xlane.xlu1 %1624 }
 0x306   :  { %2194 = vrsqrt.f32 %v4311_v2  ;;  %v1304_v62 = vsel %vm1302_vm2, %v1303_v3, %v1301_v39  ;;  %v1896_v41 = vadd.f32 %v1738_v60, %v1448_v6  ;;  %v1745_v18 = vsel %vm1743_vm4, %v1744_v49, %v1742_v5 }
 0x307   :  { %vm1323_vm10 = vcmp.eq.f32.partialorder %v4197_v37, 0.0  ;;  %2196 = vrsqrt.f32 %v4348_v14  ;;  %v1311_v0 = vsel %vm1309_vm0, %v1310_v11, %v1308_v48  ;;  %vm1757_vm12 = vcmp.eq.f32.partialorder %v4203_v54, 0.0  ;;  %v4421_v53 = vpop.xlane.xlu0 %1185 }
 0x308   :  { %v1758_v25 = vand.u32 2147483648, %v4203_v54  ;;  %2198 = vrsqrt.f32 %v4341_v29  ;;  %v1315_v51 = vsel %vm1314_vm11, %v4171_v12, %v1313_v40  ;;  %v1749_v20 = vsel %vm1748_vm5, %v4180_v19, %v1747_v32 }
 0x309   :  { %v1320_v3 = vmul.f32 %v2181_v31, %v4197_v37  ;;  %v1754_v21 = vmul.f32 %v2183_v16, %v4203_v54  ;;  %v2185_v34 = vpop.eup %2184  ;;  %v1450_v11 = vadd.f32 %v1304_v62, %v3953_v24  ;;  %v1897_v59 = vadd.f32 %v1745_v18, %v1449_v61  ;;  %v4427_v52 = vpop.xlane.xlu1 %1627 }
 0x30a   :  { %vm1328_vm13 = vcmp.eq.f32.partialorder %v4220_v57, inf  ;;  %2200 = vrsqrt.f32 %v4366_v22  ;;  %v2187_v26 = vpop.eup %2186  ;;  %v1927_v1 = vadd.f32 %v4255_v8, %v1896_v41  ;;  %v1331_v9 = vand.u32 2147483648, %v4220_v57 }
 0x30b   :  { %vm1762_vm15 = vcmp.eq.f32.partialorder %v4234_v38, inf  ;;  %2202 = vrsqrt.f32 %v4374_v15  ;;  %v1451_v24 = vadd.f32 %v1311_v0, %v3978_v56  ;;  %v1318_v49 = vsel %vm1316_vm1, %v1317_v46, %v1315_v51  ;;  %v4447_v39 = vpop.xlane.xlu0 %1188 }
 0x30c   :  { %v1752_v50 = vsel %vm1750_vm7, %v1751_v10, %v1749_v20  ;;  %vm1330_vm2 = vcmp.eq.f32.partialorder %v4220_v57, 0.0  ;;  %vm1764_vm3 = vcmp.eq.f32.partialorder %v4234_v38, 0.0  ;;  %v1322_v8 = vsel %vm1321_vm8, %v4197_v37, %v1320_v3 }
 0x30d   :  { %v1756_v6 = vsel %vm1755_vm9, %v4203_v54, %v1754_v21  ;;  %v1765_v56 = vand.u32 2147483648, %v4234_v38  ;;  %vm1335_vm6 = vcmp.eq.f32.partialorder %v4270_v17, inf  ;;  %v2189_v12 = vpop.eup %2188  ;;  %v1928_v46 = vadd.f32 %v1927_v1, %v1897_v59  ;;  %v4452_v48 = vpop.xlane.xlu1 %1630 }
 0x30e   :  { %v1327_v19 = vmul.f32 %v2185_v34, %v4220_v57  ;;  %v1761_v43 = vmul.f32 %v2187_v26, %v4234_v38  ;;  %v1338_v10 = vand.u32 2147483648, %v4270_v17  ;;  %v2191_v60 = vpop.eup %2190  ;;  %v1452_v5 = vadd.f32 %v1318_v49, %v4016_v30 }
 0x30f   :  { %v1898_v31 = vadd.f32 %v1752_v50, %v1450_v11  ;;  %vm1769_vm0 = vcmp.eq.f32.partialorder %v4280_v55, inf  ;;  %2204 = vrsqrt.f32 %v4395_v58  ;;  %v1325_v40 = vsel %vm1323_vm10, %v1324_v23, %v1322_v8  ;;  %v4475_v18 = vpop.xlane.xlu0 %1191 }
 0x310   :  { %v1759_v32 = vsel %vm1757_vm12, %v1758_v25, %v1756_v6  ;;  %vm1337_vm14 = vcmp.eq.f32.partialorder %v4270_v17, 0.0  ;;  %vm1771_vm4 = vcmp.eq.f32.partialorder %v4280_v55, 0.0  ;;  %v1772_v16 = vand.u32 2147483648, %v4280_v55 }
 0x311   :  { %2206 = vrsqrt.f32 %v4403_v35  ;;  %v2193_v30 = vpop.eup %2192  ;;  %vm1342_vm11 = vcmp.eq.f32.partialorder %v4311_v2, inf  ;;  %v1345_v61 = vand.u32 2147483648, %v4311_v2  ;;  %vm1776_vm1 = vcmp.eq.f32.partialorder %v4326_v47, inf  ;;  %v4480_v3 = vpop.xlane.xlu1 %1633 }
 0x312   :  { %v1779_v37 = vand.u32 2147483648, %v4326_v47  ;;  %v1329_v54 = vsel %vm1328_vm13, %v4220_v57, %v1327_v19  ;;  %v1763_v23 = vsel %vm1762_vm15, %v4234_v38, %v1761_v43  ;;  %v1334_v62 = vmul.f32 %v2189_v12, %v4270_v17 }
 0x313   :  { %v1768_v41 = vmul.f32 %v2191_v60, %v4280_v55  ;;  %vm1778_vm5 = vcmp.eq.f32.partialorder %v4326_v47, 0.0  ;;  %v2195_v0 = vpop.eup %2194  ;;  %v1929_v25 = vadd.f32 %v1928_v46, %v1898_v31  ;;  %v1453_v51 = vadd.f32 %v1325_v40, %v4019_v4  ;;  %v4503_v38 = vpop.xlane.xlu0 %1194  ;;  %v5012_v60 = vld [vmem:[#allocation18_spill] sm:$0xff] }
 0x314   :  { %v1899_v20 = vadd.f32 %v1759_v32, %v1451_v24  ;;  %vm1349_vm7 = vcmp.eq.f32.partialorder %v4341_v29, inf  ;;  %2208 = vrsqrt.f32 %v4427_v52  ;;  %v2197_v21 = vpop.eup %2196  ;;  %vm1344_vm8 = vcmp.eq.f32.partialorder %v4311_v2, 0.0 }
 0x315   :  { %v1775_v34 = vmul.f32 %v2193_v30, %v4326_v47  ;;  %v1352_v11 = vand.u32 2147483648, %v4341_v29  ;;  %vm1783_vm9 = vcmp.eq.f32.partialorder %v4348_v14, inf  ;;  %v1786_v59 = vand.u32 2147483648, %v4348_v14  ;;  %v2199_v26 = vpop.eup %2198 }
 0x316   :  { %v1332_v4 = vsel %vm1330_vm2, %v1331_v9, %v1329_v54  ;;  %v1766_v1 = vsel %vm1764_vm3, %v1765_v56, %v1763_v23  ;;  %vm1785_vm10 = vcmp.eq.f32.partialorder %v4348_v14, 0.0  ;;  %vm1356_vm12 = vcmp.eq.f32.partialorder %v4366_v22, inf  ;;  %v4508_v56 = vpop.xlane.xlu1 %1636 }
 0x317   :  { %v1359_v24 = vand.u32 2147483648, %v4366_v22  ;;  %v1336_v49 = vsel %vm1335_vm6, %v4270_v17, %v1334_v62  ;;  %v1770_v50 = vsel %vm1769_vm0, %v4280_v55, %v1768_v41  ;;  %v1341_v57 = vmul.f32 %v2195_v0, %v4311_v2  ;;  %v2201_v9 = vpop.eup %2200  ;;  %v4531_v62 = vpop.xlane.xlu0 %1197 }
 0x318   :  { %vm1351_vm13 = vcmp.eq.f32.partialorder %v4341_v29, 0.0  ;;  %2210 = vrsqrt.f32 %v4421_v53  ;;  %v1930_v8 = vadd.f32 %v1929_v25, %v1899_v20  ;;  %v1782_v6 = vmul.f32 %v2197_v21, %v4348_v14  ;;  %v2203_v12 = vpop.eup %2202  ;;  %v5013_v25 = vld [vmem:[#allocation19_spill] sm:$0xff] }
 0x319   :  { %vm1790_vm15 = vcmp.eq.f32.partialorder %v4374_v15, inf  ;;  %2212 = vrsqrt.f32 %v4452_v48  ;;  %v1900_v46 = vadd.f32 %v1766_v1, %v1452_v5  ;;  %v1777_v19 = vsel %vm1776_vm1, %v4326_v47, %v1775_v34 }
 0x31a   :  { %v1348_v43 = vmul.f32 %v2199_v26, %v4341_v29  ;;  %vm1358_vm2 = vcmp.eq.f32.partialorder %v4366_v22, 0.0  ;;  %2214 = vrsqrt.f32 %v4447_v39  ;;  %v1454_v31 = vadd.f32 %v1332_v4, %v5012_v60 }
 0x31b   :  { %v1339_v40 = vsel %vm1337_vm14, %v1338_v10, %v1336_v49  ;;  %v1773_v5 = vsel %vm1771_vm4, %v1772_v16, %v1770_v50  ;;  %vm1792_vm3 = vcmp.eq.f32.partialorder %v4374_v15, 0.0  ;;  %v1793_v32 = vand.u32 2147483648, %v4374_v15  ;;  %v4540_v16 = vpop.xlane.xlu1 %1639 }
 0x31c   :  { %v1343_v30 = vsel %vm1342_vm11, %v4311_v2, %v1341_v57  ;;  %v1355_v54 = vmul.f32 %v2201_v9, %v4366_v22  ;;  %vm1363_vm6 = vcmp.eq.f32.partialorder %v4395_v58, inf  ;;  %v1366_v23 = vand.u32 2147483648, %v4395_v58  ;;  %v2205_v41 = vpop.eup %2204  ;;  %v4561_v2 = vpop.xlane.xlu0 %1200  ;;  %v5014_v9 = vld [vmem:[#allocation20_spill] sm:$0xff] }
 0x31d   :  { %v1780_v17 = vsel %vm1778_vm5, %v1779_v37, %v1777_v19  ;;  %v1784_v55 = vsel %vm1783_vm9, %v4348_v14, %v1782_v6  ;;  %v1789_v10 = vmul.f32 %v2203_v12, %v4374_v15  ;;  %2216 = vrsqrt.f32 %v4480_v3  ;;  %v5015_v19 = vld [vmem:[#allocation21_spill] sm:$0xff] }
 0x31e   :  { %v1931_v0 = vadd.f32 %v1930_v8, %v1900_v46  ;;  %v1455_v20 = vadd.f32 %v1339_v40, %v5013_v25  ;;  %v1901_v21 = vadd.f32 %v1773_v5, %v1453_v51  ;;  %v1350_v47 = vsel %vm1349_vm7, %v4341_v29, %v1348_v43  ;;  %v2207_v37 = vpop.eup %2206 }
 0x31f   :  { %v1346_v34 = vsel %vm1344_vm8, %v1345_v61, %v1343_v30  ;;  %vm1365_vm0 = vcmp.eq.f32.partialorder %v4395_v58, 0.0  ;;  %vm1797_vm14 = vcmp.eq.f32.partialorder %v4403_v35, inf  ;;  %v1800_v26 = vand.u32 2147483648, %v4403_v35 }
 0x320   :  { %2218 = vrsqrt.f32 %v4475_v18  ;;  %v1902_v4 = vadd.f32 %v1780_v17, %v1454_v31  ;;  %v1787_v51 = vsel %vm1785_vm10, %v1786_v59, %v1784_v55  ;;  %v1357_v1 = vsel %vm1356_vm12, %v4366_v22, %v1355_v54  ;;  %v4570_v59 = vpop.xlane.xlu1 %1642  ;;  %v4586_v40 = vpop.xlane.xlu0 %1203 }
 0x321   :  { %vm1799_vm4 = vcmp.eq.f32.partialorder %v4403_v35, 0.0  ;;  %2220 = vrsqrt.f32 %v4503_v38  ;;  %v1353_v61 = vsel %vm1351_vm13, %v1352_v11, %v1350_v47  ;;  %v1791_v49 = vsel %vm1790_vm15, %v4374_v15, %v1789_v10  ;;  %v2209_v50 = vpop.eup %2208  ;;  %v5016_v15 = vld [vmem:[#allocation22_spill] sm:$0xff] }
 0x322   :  { %v1362_v14 = vmul.f32 %v2205_v41, %v4395_v58  ;;  %2222 = vrsqrt.f32 %v4508_v56  ;;  %v1932_v57 = vadd.f32 %v1931_v0, %v1901_v21  ;;  %v1456_v8 = vadd.f32 %v1346_v34, %v5014_v9 }
 0x323   :  { %v1796_v6 = vmul.f32 %v2207_v37, %v4403_v35  ;;  %v1373_v12 = vand.u32 2147483648, %v4421_v53  ;;  %v1903_v29 = vadd.f32 %v1787_v51, %v1455_v20  ;;  %v1360_v11 = vsel %vm1358_vm2, %v1359_v24, %v1357_v1 }
 0x324   :  { %vm1370_vm11 = vcmp.eq.f32.partialorder %v4421_v53, inf  ;;  %vm1804_vm1 = vcmp.eq.f32.partialorder %v4427_v52, inf  ;;  %vm1806_vm5 = vcmp.eq.f32.partialorder %v4427_v52, 0.0  ;;  %v1933_v46 = vadd.f32 %v1932_v57, %v1902_v4  ;;  %v4594_v30 = vpop.xlane.xlu1 %1645  ;;  %v4611_v47 = vpop.xlane.xlu0 %1206 }
 0x325   :  { %v1457_v43 = vadd.f32 %v1353_v61, %v5015_v19  ;;  %v1794_v60 = vsel %vm1792_vm3, %v1793_v32, %v1791_v49  ;;  %v1807_v31 = vand.u32 2147483648, %v4427_v52  ;;  %v2211_v5 = vpop.eup %2210  ;;  %v1364_v22 = vsel %vm1363_vm6, %v4395_v58, %v1362_v14 }
 0x326   :  { %v1803_v24 = vmul.f32 %v2209_v50, %v4427_v52  ;;  %vm1377_vm7 = vcmp.eq.f32.partialorder %v4447_v39, inf  ;;  %2224 = vrsqrt.f32 %v4540_v16  ;;  %v2213_v54 = vpop.eup %2212  ;;  %v1458_v32 = vadd.f32 %v1360_v11, %v5016_v15 }
 0x327   :  { %v1798_v17 = vsel %vm1797_vm14, %v4403_v35, %v1796_v6  ;;  %vm1372_vm8 = vcmp.eq.f32.partialorder %v4421_v53, 0.0  ;;  %v1380_v55 = vand.u32 2147483648, %v4447_v39  ;;  %2226 = vrsqrt.f32 %v4531_v62  ;;  %v2215_v10 = vpop.eup %2214 }
 0x328   :  { %v1934_v41 = vadd.f32 %v1933_v46, %v1903_v29  ;;  %v1904_v0 = vadd.f32 %v1794_v60, %v1456_v8  ;;  %vm1811_vm9 = vcmp.eq.f32.partialorder %v4452_v48, inf  ;;  %vm1813_vm10 = vcmp.eq.f32.partialorder %v4452_v48, 0.0  ;;  %v4642_v11 = vpop.xlane.xlu0 %1209 }
 0x329   :  { %v1367_v25 = vsel %vm1365_vm0, %v1366_v23, %v1364_v22  ;;  %v1369_v20 = vmul.f32 %v2211_v5, %v4421_v53  ;;  %vm1379_vm12 = vcmp.eq.f32.partialorder %v4447_v39, 0.0  ;;  %v1814_v21 = vand.u32 2147483648, %v4452_v48  ;;  %v4620_v23 = vpop.xlane.xlu1 %1648 }
 0x32a   :  { %2228 = vrsqrt.f32 %v4570_v59  ;;  %v1801_v37 = vsel %vm1799_vm4, %v1800_v26, %v1798_v17  ;;  %v1805_v34 = vsel %vm1804_vm1, %v4427_v52, %v1803_v24  ;;  %v1810_v58 = vmul.f32 %v2213_v54, %v4452_v48  ;;  %v2217_v4 = vpop.eup %2216  ;;  %v5017_v26 = vld [vmem:[#allocation23_spill] sm:$0xff] }
 0x32b   :  { %2230 = vrsqrt.f32 %v4561_v2  ;;  %v1376_v51 = vmul.f32 %v2215_v10, %v4447_v39  ;;  %vm1384_vm13 = vcmp.eq.f32.partialorder %v4475_v18, inf  ;;  %v1387_v1 = vand.u32 2147483648, %v4475_v18 }
 0x32c   :  { %2232 = vrsqrt.f32 %v4594_v30  ;;  %v1935_v35 = vadd.f32 %v1934_v41, %v1904_v0  ;;  %v1459_v61 = vadd.f32 %v1367_v25, %v5017_v26  ;;  %vm1818_vm15 = vcmp.eq.f32.partialorder %v4480_v3, inf }
 0x32d   :  { %vm1820_vm2 = vcmp.eq.f32.partialorder %v4480_v3, 0.0  ;;  %v2219_v49 = vpop.eup %2218  ;;  %v1905_v14 = vadd.f32 %v1801_v37, %v1457_v43  ;;  %v1371_v50 = vsel %vm1370_vm11, %v4421_v53, %v1369_v20  ;;  %v1808_v57 = vsel %vm1806_vm5, %v1807_v31, %v1805_v34  ;;  %v4650_v43 = vpop.xlane.xlu1 %1651 }
 0x32e   :  { %2234 = vrsqrt.f32 %v4586_v40  ;;  %v2221_v9 = vpop.eup %2220  ;;  %v1812_v8 = vsel %vm1811_vm9, %v4452_v48, %v1810_v58  ;;  %vm1386_vm3 = vcmp.eq.f32.partialorder %v4475_v18, 0.0  ;;  %v1817_v6 = vmul.f32 %v2217_v4, %v4480_v3  ;;  %v4680_v20 = vpop.xlane.xlu0 %1212 }
 0x32f   :  { %v1821_v29 = vand.u32 2147483648, %v4480_v3  ;;  %vm1391_vm6 = vcmp.eq.f32.partialorder %v4503_v38, inf  ;;  %v2223_v46 = vpop.eup %2222  ;;  %v1378_v52 = vsel %vm1377_vm7, %v4447_v39, %v1376_v51  ;;  %v1394_v19 = vand.u32 2147483648, %v4503_v38 }
 0x330   :  { %vm1825_vm0 = vcmp.eq.f32.partialorder %v4508_v56, inf  ;;  %2236 = vrsqrt.f32 %v4620_v23  ;;  %v1374_v60 = vsel %vm1372_vm8, %v1373_v12, %v1371_v50  ;;  %v1906_v31 = vadd.f32 %v1808_v57, %v1458_v32 }
 0x331   :  { %v1383_v5 = vmul.f32 %v2219_v49, %v4475_v18  ;;  %vm1393_vm14 = vcmp.eq.f32.partialorder %v4503_v38, 0.0  ;;  %2238 = vrsqrt.f32 %v4611_v47  ;;  %v1936_v22 = vadd.f32 %v1935_v35, %v1905_v14  ;;  %v4688_v34 = vpop.xlane.xlu1 %1654 }
 0x332   :  { %v1815_v24 = vsel %vm1813_vm10, %v1814_v21, %v1812_v8  ;;  %vm1827_vm4 = vcmp.eq.f32.partialorder %v4508_v56, 0.0  ;;  %v1828_v54 = vand.u32 2147483648, %v4508_v56  ;;  %v1381_v15 = vsel %vm1379_vm12, %v1380_v55, %v1378_v52 }
 0x333   :  { %v1819_v53 = vsel %vm1818_vm15, %v4480_v3, %v1817_v6  ;;  %v1390_v12 = vmul.f32 %v2221_v9, %v4503_v38  ;;  %v1824_v32 = vmul.f32 %v2223_v46, %v4508_v56  ;;  %vm1398_vm11 = vcmp.eq.f32.partialorder %v4531_v62, inf  ;;  %v2225_v17 = vpop.eup %2224 }
 0x334   :  { %v1460_v48 = vadd.f32 %v1374_v60, %v4274_v44  ;;  %v1401_v10 = vand.u32 2147483648, %v4531_v62  ;;  %vm1832_vm1 = vcmp.eq.f32.partialorder %v4540_v16, inf  ;;  %v1835_v39 = vand.u32 2147483648, %v4540_v16  ;;  %v2227_v55 = vpop.eup %2226 }
 0x335   :  { %v1937_v41 = vadd.f32 %v1936_v22, %v1906_v31  ;;  %v1907_v0 = vadd.f32 %v1815_v24, %v1459_v61  ;;  %v1385_v25 = vsel %vm1384_vm13, %v4475_v18, %v1383_v5  ;;  %vm1834_vm5 = vcmp.eq.f32.partialorder %v4540_v16, 0.0 }
 0x336   :  { %2240 = vrsqrt.f32 %v4642_v11  ;;  %v1461_v44 = vadd.f32 %v1381_v15, %v4284_v42  ;;  %v1822_v21 = vsel %vm1820_vm2, %v1821_v29, %v1819_v53  ;;  %vm1400_vm7 = vcmp.eq.f32.partialorder %v4531_v62, 0.0 }
 0x337   :  { %v1408_v37 = vand.u32 2147483648, %v4561_v2  ;;  %2242 = vrsqrt.f32 %v4650_v43  ;;  %v2229_v58 = vpop.eup %2228  ;;  %v1392_v4 = vsel %vm1391_vm6, %v4503_v38, %v1390_v12  ;;  %v1826_v42 = vsel %vm1825_vm0, %v4508_v56, %v1824_v32  ;;  %v4723_v38 = vpop.xlane.xlu0 %1660 }
 0x338   :  { %v1831_v3 = vmul.f32 %v2225_v17, %v4540_v16  ;;  %vm1405_vm8 = vcmp.eq.f32.partialorder %v4561_v2, inf  ;;  %vm1839_vm9 = vcmp.eq.f32.partialorder %v4570_v59, inf  ;;  %v2231_v51 = vpop.eup %2230  ;;  %v1388_v35 = vsel %vm1386_vm3, %v1387_v1, %v1385_v25 }
 0x339   :  { %v1397_v26 = vmul.f32 %v2227_v55, %v4531_v62  ;;  %vm1841_vm10 = vcmp.eq.f32.partialorder %v4570_v59, 0.0  ;;  %v1842_v61 = vand.u32 2147483648, %v4570_v59  ;;  %2244 = vrsqrt.f32 %v4680_v20  ;;  %v2233_v49 = vpop.eup %2232 }
 0x33a   :  { %v1938_v14 = vadd.f32 %v1937_v41, %v1907_v0  ;;  %v1908_v50 = vadd.f32 %v1822_v21, %v1460_v48  ;;  %vm1412_vm12 = vcmp.eq.f32.partialorder %v4586_v40, inf  ;;  %v1415_v57 = vand.u32 2147483648, %v4586_v40 }
 0x33b   :  { %vm1846_vm13 = vcmp.eq.f32.partialorder %v4594_v30, inf  ;;  %v1395_v18 = vsel %vm1393_vm14, %v1394_v19, %v1392_v4  ;;  %v1829_v1 = vsel %vm1827_vm4, %v1828_v54, %v1826_v42  ;;  %vm1407_vm15 = vcmp.eq.f32.partialorder %v4561_v2, 0.0  ;;  %v2235_v8 = vpop.eup %2234  ;;  %v4732_v19 = vpop.xlane.xlu1 %1657 }
 0x33c   :  { %v1838_v9 = vmul.f32 %v2229_v58, %v4570_v59  ;;  %vm1848_vm2 = vcmp.eq.f32.partialorder %v4594_v30, 0.0  ;;  %v1462_v6 = vadd.f32 %v1388_v35, %v4295_v33  ;;  %v1833_v29 = vsel %vm1832_vm1, %v4540_v16, %v1831_v3 }
 0x33d   :  { %v1849_v46 = vand.u32 2147483648, %v4594_v30  ;;  %2246 = vrsqrt.f32 %v4688_v34  ;;  %v1399_v56 = vsel %vm1398_vm11, %v4531_v62, %v1397_v26  ;;  %v1404_v52 = vmul.f32 %v2231_v51, %v4561_v2  ;;  %v2237_v60 = vpop.eup %2236 }
 0x33e   :  { %vm1414_vm3 = vcmp.eq.f32.partialorder %v4586_v40, 0.0  ;;  %v1845_v33 = vmul.f32 %v2233_v49, %v4594_v30  ;;  %vm1419_vm6 = vcmp.eq.f32.partialorder %v4611_v47, inf  ;;  %v1939_v31 = vadd.f32 %v1938_v14, %v1908_v50  ;;  %v2239_v54 = vpop.eup %2238 }
 0x33f   :  { %v1463_v5 = vadd.f32 %v1395_v18, %v4298_v45  ;;  %v1909_v22 = vadd.f32 %v1829_v1, %v1461_v44  ;;  %v1422_v24 = vand.u32 2147483648, %v4611_v47  ;;  %v1836_v15 = vsel %vm1834_vm5, %v1835_v39, %v1833_v29 }
 0x340   :  { %v1840_v53 = vsel %vm1839_vm9, %v4570_v59, %v1838_v9  ;;  %v1411_v12 = vmul.f32 %v2235_v8, %v4586_v40  ;;  %2248 = vrsqrt.f32 %v4723_v38  ;;  %v1402_v32 = vsel %vm1400_vm7, %v1401_v10, %v1399_v56 }
 0x341   :  { %vm1421_vm0 = vcmp.eq.f32.partialorder %v4611_v47, 0.0  ;;  %v1852_v45 = vmul.f32 %v2237_v60, %v4620_v23  ;;  %vm1853_vm14 = vcmp.eq.f32.partialorder %v4620_v23, inf  ;;  %2250 = vrsqrt.f32 %v4732_v19 }
 0x342   :  { %v1406_v16 = vsel %vm1405_vm8, %v4561_v2, %v1404_v52  ;;  %v1847_v17 = vsel %vm1846_vm13, %v4594_v30, %v1845_v33  ;;  %vm1855_vm4 = vcmp.eq.f32.partialorder %v4620_v23, 0.0  ;;  %v1856_v62 = vand.u32 2147483648, %v4620_v23 }
 0x343   :  { %v1910_v48 = vadd.f32 %v1836_v15, %v1462_v6  ;;  %v1843_v10 = vsel %vm1841_vm10, %v1842_v61, %v1840_v53  ;;  %v1418_v39 = vmul.f32 %v2239_v54, %v4611_v47  ;;  %vm1426_vm11 = vcmp.eq.f32.partialorder %v4642_v11, inf  ;;  %v2241_v55 = vpop.eup %2240 }
 0x344   :  { %v1940_v41 = vadd.f32 %v1939_v31, %v1909_v22  ;;  %v1464_v0 = vadd.f32 %v1402_v32, %v4302_v36  ;;  %v1413_v25 = vsel %vm1412_vm12, %v4586_v40, %v1411_v12  ;;  %v1429_v44 = vand.u32 2147483648, %v4642_v11  ;;  %v2243_v21 = vpop.eup %2242 }
 0x345   :  { %v1409_v59 = vsel %vm1407_vm15, %v1408_v37, %v1406_v16  ;;  %v1850_v58 = vsel %vm1848_vm2, %v1849_v46, %v1847_v17  ;;  %v1854_v4 = vsel %vm1853_vm14, %v4620_v23, %v1852_v45  ;;  %vm1428_vm1 = vcmp.eq.f32.partialorder %v4642_v11, 0.0 }
 0x346   :  { %vm1860_vm5 = vcmp.eq.f32.partialorder %v4650_v43, inf  ;;  %v1911_v36 = vadd.f32 %v1843_v10, %v1463_v5  ;;  %v1859_v42 = vmul.f32 %v2243_v21, %v4650_v43  ;;  %vm1862_vm7 = vcmp.eq.f32.partialorder %v4650_v43, 0.0  ;;  %v2245_v2 = vpop.eup %2244 }
 0x347   :  { %v1863_v3 = vand.u32 2147483648, %v4650_v43  ;;  %v1941_v37 = vadd.f32 %v1940_v41, %v1910_v48  ;;  %v1416_v30 = vsel %vm1414_vm3, %v1415_v57, %v1413_v25  ;;  %v1420_v51 = vsel %vm1419_vm6, %v4611_v47, %v1418_v39 }
 0x348   :  { %v1425_v35 = vmul.f32 %v2241_v55, %v4642_v11  ;;  %v1465_v26 = vadd.f32 %v1409_v59, %v4305_v27  ;;  %v1912_v61 = vadd.f32 %v1850_v58, %v1464_v0  ;;  %v1857_v49 = vsel %vm1855_vm4, %v1856_v62, %v1854_v4 }
 0x349   :  { %v1861_v14 = vsel %vm1860_vm5, %v4650_v43, %v1859_v42  ;;  %v1432_v50 = vmul.f32 %v2245_v2, %v4680_v20  ;;  %vm1433_vm8 = vcmp.eq.f32.partialorder %v4680_v20, inf  ;;  %vm1435_vm9 = vcmp.eq.f32.partialorder %v4680_v20, 0.0 }
 0x34a   :  { %v1436_v40 = vand.u32 2147483648, %v4680_v20  ;;  %v2247_v57 = vpop.eup %2246  ;;  %v1942_v18 = vadd.f32 %v1941_v37, %v1911_v36  ;;  %v1466_v1 = vadd.f32 %v1416_v30, %v4314_v7  ;;  %v1423_v27 = vsel %vm1421_vm0, %v1422_v24, %v1420_v51 }
 0x34b   :  { %v1864_v23 = vsel %vm1862_vm7, %v1863_v3, %v1861_v14  ;;  %v1913_v9 = vadd.f32 %v1857_v49, %v1465_v26  ;;  %v1427_v8 = vsel %vm1426_vm11, %v4642_v11, %v1425_v35  ;;  %v1866_v6 = vmul.f32 %v2247_v57, %v4688_v34 }
 0x34c   :  { %vm1867_vm10 = vcmp.eq.f32.partialorder %v4688_v34, inf  ;;  %v1943_v29 = vadd.f32 %v1942_v18, %v1912_v61  ;;  %vm1869_vm12 = vcmp.eq.f32.partialorder %v4688_v34, 0.0  ;;  %v1870_v7 = vand.u32 2147483648, %v4688_v34 }
 0x34d   :  { %vm1881_vm13 = vcmp.eq.f32.partialorder %v4723_v38, inf  ;;  %v2249_v47 = vpop.eup %2248  ;;  %v1467_v43 = vadd.f32 %v1423_v27, %v4308_v13  ;;  %v1914_v46 = vadd.f32 %v1864_v23, %v1466_v1  ;;  %v1434_v56 = vsel %vm1433_vm8, %v4680_v20, %v1432_v50 }
 0x34e   :  { %v1868_v52 = vsel %vm1867_vm10, %v4688_v34, %v1866_v6  ;;  %v2251_v33 = vpop.eup %2250  ;;  %v1430_v60 = vsel %vm1428_vm1, %v1429_v44, %v1427_v8  ;;  %v1880_v5 = vmul.f32 %v2249_v47, %v4723_v38  ;;  %vm1883_vm15 = vcmp.eq.f32.partialorder %v4723_v38, 0.0 }
 0x34f   :  { %v1871_v31 = vsel %vm1869_vm12, %v1870_v7, %v1868_v52  ;;  %v1944_v22 = vadd.f32 %v1943_v29, %v1913_v9  ;;  %v1884_v13 = vand.u32 2147483648, %v4723_v38  ;;  %v1873_v54 = vmul.f32 %v2251_v33, %v4732_v19 }
 0x350   :  { %v1915_v24 = vadd.f32 %v1871_v31, %v1467_v43  ;;  %v1437_v15 = vsel %vm1435_vm9, %v1436_v40, %v1434_v56  ;;  %v1882_v34 = vsel %vm1881_vm13, %v4723_v38, %v1880_v5  ;;  %vm1874_vm2 = vcmp.eq.f32.partialorder %v4732_v19, inf }
 0x351   :  { %v1877_v11 = vand.u32 2147483648, %v4732_v19  ;;  %v1945_v53 = vadd.f32 %v1944_v22, %v1914_v46  ;;  %v1468_v12 = vadd.f32 %v1430_v60, %v4320_v63  ;;  %v1875_v32 = vsel %vm1874_vm2, %v4732_v19, %v1873_v54 }
 0x352   :  { %vm1876_vm3 = vcmp.eq.f32.partialorder %v4732_v19, 0.0  ;;  %v1885_v45 = vsel %vm1883_vm15, %v1884_v13, %v1882_v34  ;;  %v1469_v20 = vadd.f32 %v1437_v15, %v4317_v28  ;;  %vm1955_vm6 = vcmask 0  }
 0x353   :  { %v1878_v16 = vsel %vm1876_vm3, %v1877_v11, %v1875_v32  ;;  %v1946_v62 = vadd.f32 %v1945_v53, %v1915_v24 }
 0x354   :  { %v1916_v17 = vadd.f32 %v1878_v16, %v1468_v12  ;;  %v1917_v48 = vadd.f32 %v1885_v45, %v1469_v20 }
 0x356   :  { %v1947_v10 = vadd.f32 %v1946_v62, %v1916_v17 }
 0x358   :  { %v1948_v38 = vadd.f32 %v1947_v10, %v1917_v48 }
 0x35a   :  { %v1949_v39 = vrot.slane %v1948_v38, 4 }
 0x35c   :  { %v1950_v55 = vadd.f32 %v1949_v39, %v1948_v38 }
 0x35e   :  { %v1951_v41 = vrot.slane %v1950_v55, 2 }
 0x360   :  { %v1952_v0 = vadd.f32 %v1951_v41, %v1950_v55 }
 0x362   :  { %v1953_v63 = vrot.slane %v1952_v0, 1 }
 0x364   :  { %v1954_v25 = vadd.f32 %v1953_v63, %v1952_v0 }
 0x366   :  { %1956 = vst.msk [vmem:[#allocation6] sm:$0x1] %vm1955_vm6, %v1954_v25 }
 0x367   :  { %2303 = shalt.err (!%p2300_p0)
}
 0x368   :  { %1978 = dma.vmem_to_hbm [thread:$0]  %s1976_s15, 16, %s4835_s3, [#allocation7]  }
 0x369   :  { %2314 = dma.done.wait [#allocation4], 4096  }
 0x36a   :  { %2315 = vsyncadd [#allocation4], 4294963200 }
 0x36b   :  { %2316 = dma.done.wait [#allocation7], 16  }
 0x36c   :  { %2317 = vsyncadd [#allocation7], 4294967280 }
 0x36d   :  { %1985 = vsyncpa [#allocation3], 1 }
 0x36e   :  { %1986 = vsyncpa [#allocation4], 1 }
 0x36f   :  { %1987 = vsyncpa [#allocation7], 1 }

</bundles_post_ra>
